<compile_context>
chip_gen: v6e
topology: v6e:2x2x1
jax: 0.10.0
libtpu: 0.0.40
codegen_flags: <defaults>
</compile_context>

<pallas_src>
import functools

import jax
import jax.numpy as jnp
from jax.experimental import pallas as pl
from jax.experimental.pallas import tpu as pltpu

EPS = 1e-5
LANE = 128   # pad channel dims to a multiple of this (lane-dense MXU operands / stores)


def _round_up(x, m):
    return (x + m - 1) // m * m


def _fold_bn(gamma, beta, mean, var, eps=EPS):
    scale = gamma * jax.lax.rsqrt(var + eps)
    return scale, beta - mean * scale


# ---------------------------------------------------------------------------
# Fused residual-block kernel
# ---------------------------------------------------------------------------
def _make_block_kernel(stride, Ho, Wo, Ws, has_sc_conv):
    """One grid step = one image, full spatial extent.

    Ws = round_up(Wo + 1, 8): operand/accumulator width.  Columns [Wo, Ws) are zero, so the
    left/right conv halos are obtained for free from pltpu.roll's wrap-around on the flat
    (Ho*Ws) row axis of the f32 MXU products.
    """
    M = Ho * Ws  # flat rows of every MXU operand / accumulator

    def kernel(x_ref, w1_ref, b1_ref, w2_ref, b2_ref, *rest):
        if has_sc_conv:
            wsc_ref, bsc_ref, out_ref, y1_ref = rest
        else:
            out_ref, y1_ref = rest
        cin_p = x_ref.shape[-1]
        cout_p = out_ref.shape[-1]
        cdt = y1_ref.dtype

        # ---- halo ring of the y1 scratch (rows 0 / Ho+1, trailing pad cols).  Cheap: the
        # interior [1:Ho+1, 0:Wo) is fully overwritten below, so only the ring is stored here.
        y1_ref[0:1, :, :] = jnp.zeros((1, Ws, cout_p), cdt)
        y1_ref[Ho + 1:Ho + 2, :, :] = jnp.zeros((1, Ws, cout_p), cdt)
        y1_ref[:, Wo:Ws, :] = jnp.zeros((Ho + 2, Ws - Wo, cout_p), cdt)

        def shifted_add(acc, prod, shift):
            # acc[r*Ws + c] += prod[r*Ws + c + c0]   with shift = (-c0) mod M.
            # Wrapped-in rows land only on zero pad columns / discarded (c >= Wo) positions.
            if shift == 0:
                return acc + prod
            return acc + pltpu.roll(prod, shift, axis=0)

        # -------- conv1: 3x3, stride s, pad 1  (+ folded BN scale, +bias, ReLU in f32) ------
        acc1 = jnp.zeros((M, cout_p), jnp.float32)
        for kh in range(3):
            if stride == 1:
                slab = x_ref[0, 0, kh:kh + Ho, :, :].reshape(M, cin_p)
                plan = [(slab, 1), (slab, 0), (slab, M - 1)]           # kw = 0, 1, 2
            else:
                a, r0 = kh % 2, kh // 2
                s0 = x_ref[0, 2 * a + 0, r0:r0 + Ho, :, :].reshape(M, cin_p)
                s1 = x_ref[0, 2 * a + 1, r0:r0 + Ho, :, :].reshape(M, cin_p)
                plan = [(s0, 0), (s1, 0), (s0, M - 1)]                 # kw = 0, 1, 2
            for kw, (xop, shift) in enumerate(plan):
                prod = jnp.dot(xop, w1_ref[kh * 3 + kw],
                               preferred_element_type=jnp.float32)
                acc1 = shifted_add(acc1, prod, shift)
        y1 = jnp.maximum(acc1 + b1_ref[...], 0.0).reshape(Ho, Ws, cout_p)
        # store the interior only -> the (persistent-free) zero ring stays intact for conv2
        y1_ref[1:Ho + 1, 0:Wo, :] = y1[:, :Wo, :].astype(cdt)

        # -------- shortcut on the same tile: 1x1 conv(stride) + folded BN, or identity -------
        if stride == 1:
            xs = x_ref[0, 0, 1:1 + Ho, :, :].reshape(M, cin_p)
        else:
            xs = x_ref[0, 3, 0:Ho, :, :].reshape(M, cin_p)             # phase (1,1) = x[2r, 2c]
        if has_sc_conv:
            sc = jnp.dot(xs, wsc_ref[...], preferred_element_type=jnp.float32)
            sc = sc + bsc_ref[...]
        else:
            sc = xs.astype(jnp.float32)

        # -------- conv2: 3x3, stride 1, pad 1  (+bias + residual add + ReLU, f32 epilogue) ---
        acc2 = jnp.zeros((M, cout_p), jnp.float32)
        for kh in range(3):
            yop = y1_ref[kh:kh + Ho, :, :].reshape(M, cout_p)
            for kw in range(3):
                prod = jnp.dot(yop, w2_ref[kh * 3 + kw],
                               preferred_element_type=jnp.float32)
                acc2 = shifted_add(acc2, prod, (1 - kw) % M)
        out = jnp.maximum(acc2 + b2_ref[...] + sc, 0.0).reshape(Ho, Ws, cout_p)
        out_ref[0] = out[:, :Wo, :].astype(out_ref.dtype)

    return kernel


# ---------------------------------------------------------------------------
# Wrapper glue: BN folding, channel/width padding, stride-phase split
# ---------------------------------------------------------------------------
def residual_block_forward_nhwc(x, p, stride, compute_dtype=jnp.bfloat16, out_dtype=None):
    """Fused ResidualBlock forward, NHWC in / NHWC out (preferred entry point: no transposes).

    Set out_dtype=jnp.bfloat16 when the consumer casts anyway (halves output HBM writes).
    """
    N, H, W, Cin = x.shape
    Cout = p["w1"].shape[-1]
    Ho = (H - 1) // stride + 1
    Wo = (W - 1) // stride + 1
    Ws = _round_up(Wo + 1, 8)            # operand width: >=1 zero halo col, sublane aligned
    cin_p = _round_up(Cin, LANE)
    cout_p = _round_up(Cout, LANE)
    has_sc_conv = (stride != 1) or (Cin != Cout)
    out_dtype = x.dtype if out_dtype is None else out_dtype

    # Fold BN scale into the weight columns; pad channels to lane width; bf16 MXU operands.
    s1, b1 = _fold_bn(p["g1"], p["b1"], p["m1"], p["v1"])
    w1 = jnp.pad((p["w1"] * s1).reshape(9, Cin, Cout),
                 ((0, 0), (0, cin_p - Cin), (0, cout_p - Cout))).astype(compute_dtype)
    b1p = jnp.pad(b1, (0, cout_p - Cout)).reshape(1, cout_p).astype(jnp.float32)
    s2, b2 = _fold_bn(p["g2"], p["b2"], p["m2"], p["v2"])
    w2 = jnp.pad((p["w2"] * s2).reshape(9, Cout, Cout),
                 ((0, 0), (0, cout_p - Cout), (0, cout_p - Cout))).astype(compute_dtype)
    b2p = jnp.pad(b2, (0, cout_p - Cout)).reshape(1, cout_p).astype(jnp.float32)

    # Input prep.  stride=1: single fused pad(+channel pad)+cast (columns [W, Ws) zero give the
    # W halos via roll wrap-around; rows padded 1/1).  stride=2: one pad+cast plus a single
    # reshape/transpose materializing the 4 stride phases, so every in-kernel tap is an aligned
    # contiguous slice (same total bytes as the padded input).
    if stride == 1:
        xk = jnp.pad(x, ((0, 0), (1, 1), (0, Ws - W), (0, cin_p - Cin))
                     ).astype(compute_dtype)[:, None]                # (N, 1, H+2, Ws, cin_p)
    else:
        Hph = Ho + 1
        xp = jnp.pad(x, ((0, 0), (1, 2 * Hph - H - 1), (1, 2 * Ws - W - 1),
                         (0, cin_p - Cin))).astype(compute_dtype)
        xk = xp.reshape(N, Hph, 2, Ws, 2, cin_p).transpose(0, 2, 4, 1, 3, 5)
        xk = xk.reshape(N, 4, Hph, Ws, cin_p)                        # (N, 4, Hph, Ws, cin_p)

    args = [xk, w1, b1p, w2, b2p]
    in_specs = [
        pl.BlockSpec((1,) + xk.shape[1:], lambda n: (n, 0, 0, 0, 0)),
        # NOTE(v7x): these grid-invariant weight/bias blocks could use pipeline_mode=
        # pl.Buffered(1) to halve their VMEM footprint under the 64 MiB budget.
        pl.BlockSpec(w1.shape, lambda n: (0, 0, 0)),
        pl.BlockSpec(b1p.shape, lambda n: (0, 0)),
        pl.BlockSpec(w2.shape, lambda n: (0, 0, 0)),
        pl.BlockSpec(b2p.shape, lambda n: (0, 0)),
    ]
    if has_sc_conv:
        ssc, bsc = _fold_bn(p["gsc"], p["bsc"], p["msc"], p["vsc"])
        wsc = jnp.pad(p["wsc"] * ssc,
                      ((0, cin_p - Cin), (0, cout_p - Cout))).astype(compute_dtype)
        bscp = jnp.pad(bsc, (0, cout_p - Cout)).reshape(1, cout_p).astype(jnp.float32)
        args += [wsc, bscp]
        in_specs += [pl.BlockSpec(wsc.shape, lambda n: (0, 0)),
                     pl.BlockSpec(bscp.shape, lambda n: (0, 0))]

    out = pl.pallas_call(
        _make_block_kernel(stride, Ho, Wo, Ws, has_sc_conv),
        grid=(N,),
        in_specs=in_specs,
        out_specs=pl.BlockSpec((1, Ho, Wo, cout_p), lambda n: (n, 0, 0, 0)),
        out_shape=jax.ShapeDtypeStruct((N, Ho, Wo, cout_p), out_dtype),
        scratch_shapes=[pltpu.VMEM((Ho + 2, Ws, cout_p), compute_dtype)],
        compiler_params=pltpu.CompilerParams(
            dimension_semantics=("parallel",),
            vmem_limit_bytes=56 * 1024 * 1024),
    )(*args)

    if cout_p != Cout:
        out = out[..., :Cout]   # TODO(synk): keep padded channels when the consumer accepts them
    return out


def residual_block_forward(x_nchw, p, stride, compute_dtype=jnp.bfloat16, out_dtype=None):
    """NCHW adapter matching the PyTorch module; prefer the NHWC entry point in real networks."""
    x = jnp.transpose(x_nchw, (0, 2, 3, 1))
    out = residual_block_forward_nhwc(x, p, stride, compute_dtype, out_dtype)
    return jnp.transpose(out, (0, 3, 1, 2))


# ---------------------------------------------------------------------------
# Pure-JAX reference (lax.conv); compute_dtype=bf16 mirrors the kernel's math
# ---------------------------------------------------------------------------
def reference_forward(x_nchw, p, stride, compute_dtype=jnp.float32):
    x = jnp.transpose(x_nchw, (0, 2, 3, 1))
    Cin, Cout = x.shape[-1], p["w1"].shape[-1]

    def conv(inp, w, s, pad):
        return jax.lax.conv_general_dilated(
            inp.astype(compute_dtype), w.astype(compute_dtype), (s, s),
            [(pad, pad), (pad, pad)],
            dimension_numbers=("NHWC", "HWIO", "NHWC"),
            preferred_element_type=jnp.float32)

    s1, b1 = _fold_bn(p["g1"], p["b1"], p["m1"], p["v1"])
    y1 = jax.nn.relu(conv(x, p["w1"] * s1, stride, 1) + b1)
    s2, b2 = _fold_bn(p["g2"], p["b2"], p["m2"], p["v2"])
    out = conv(y1, p["w2"] * s2, 1, 1) + b2

    if stride != 1 or Cin != Cout:
        ssc, bsc = _fold_bn(p["gsc"], p["bsc"], p["msc"], p["vsc"])
        sc = conv(x, (p["wsc"] * ssc)[None, None], stride, 0) + bsc
    else:
        sc = x.astype(compute_dtype).astype(jnp.float32)
    return jnp.transpose(jax.nn.relu(out + sc), (0, 3, 1, 2))


# ---------------------------------------------------------------------------
if __name__ == "__main__":
    root = jax.random.PRNGKey(0)

    def bn_params(keys, c, tag):
        return {
            "g" + tag: 0.5 + jax.random.uniform(keys[0], (c,), jnp.float32),
            "b" + tag: 0.1 * jax.random.normal(keys[1], (c,), jnp.float32),
            "m" + tag: 0.1 * jax.random.normal(keys[2], (c,), jnp.float32),
            "v" + tag: 0.5 + jax.random.uniform(keys[3], (c,), jnp.float32),
        }

    def make_params(key, cin, cout, need_sc):
        ks = jax.random.split(key, 16)
        p = dict(w1=0.2 * jax.random.normal(ks[0], (3, 3, cin, cout), jnp.float32),
                 w2=0.2 * jax.random.normal(ks[1], (3, 3, cout, cout), jnp.float32))
        p.update(bn_params(ks[2:6], cout, "1"))
        p.update(bn_params(ks[6:10], cout, "2"))
        if need_sc:
            p["wsc"] = 0.2 * jax.random.normal(ks[10], (cin, cout), jnp.float32)
            p.update(bn_params(ks[11:15], cout, "sc"))
        return p

    # (N, Cin, H, W, Cout, stride): downsampling block (conv shortcut), identity-shortcut block,
    # and an odd-spatial / Wo%8!=0 downsampling block (exercises the masked-store paths).
    configs = [(2, 4, 16, 16, 8, 2), (2, 8, 16, 16, 8, 1), (1, 4, 13, 13, 8, 2)]

    for idx, (N, Cin, H, W, Cout, stride) in enumerate(configs):
        kx, kp = jax.random.split(jax.random.fold_in(root, idx))
        need_sc = (stride != 1) or (Cin != Cout)
        params = make_params(kp, Cin, Cout, need_sc)
        x = jax.random.normal(kx, (N, Cin, H, W), jnp.float32)

        fwd = jax.jit(functools.partial(residual_block_forward, stride=stride))
        out = jax.block_until_ready(fwd(x, params))
        Ho, Wo = (H - 1) // stride + 1, (W - 1) // stride + 1
        assert out.shape == (N, Cout, Ho, Wo), out.shape

        # structural check against a matched-precision (bf16 operand) lax.conv reference
        ref_bf16 = reference_forward(x, params, stride, compute_dtype=jnp.bfloat16)
        err = float(jnp.max(jnp.abs(out - ref_bf16)))
        assert err < 3e-2, f"config {idx}: mismatch vs matched reference: {err}"

        # loose sanity check against the full-f32 reference (bounds bf16 MXU rounding)
        ref_f32 = reference_forward(x, params, stride, compute_dtype=jnp.float32)
        err32 = float(jnp.max(jnp.abs(out - ref_f32)))
        assert err32 < 0.25, f"config {idx}: mismatch vs f32 reference: {err32}"

    print("KERNEL_OK")
</pallas_src>

<mosaic_0001>
module attributes {stable_mosaic.version = 11 : i64} {
  func.func @kernel(%arg0: i32, %arg1: memref<1x4x9x16x128xbf16, #tpu.memory_space<vmem>>, %arg2: memref<9x128x128xbf16, #tpu.memory_space<vmem>>, %arg3: memref<1x128xf32, #tpu.memory_space<vmem>>, %arg4: memref<9x128x128xbf16, #tpu.memory_space<vmem>>, %arg5: memref<1x128xf32, #tpu.memory_space<vmem>>, %arg6: memref<128x128xbf16, #tpu.memory_space<vmem>>, %arg7: memref<1x128xf32, #tpu.memory_space<vmem>>, %arg8: memref<1x8x8x128xf32, #tpu.memory_space<vmem>>, %arg9: memref<10x16x128xbf16, #tpu.memory_space<vmem>>) attributes {dimension_semantics = [#tpu.dimension_semantics<parallel>], iteration_bounds = array<i64: 2>, scalar_prefetch = 0 : i64, scratch_operands = 1 : i64, tpu.core_type = #tpu.core_type<tc>, window_params = [{transform_indices = @transform_0, window_bounds = array<i64: 1, 4, 9, 16, 128>}, {pipeline_mode = #tpu.pipeline_mode<synchronous>, transform_indices = @transform_1, window_bounds = array<i64: 9, 128, 128>}, {pipeline_mode = #tpu.pipeline_mode<synchronous>, transform_indices = @transform_2, window_bounds = array<i64: 1, 128>}, {pipeline_mode = #tpu.pipeline_mode<synchronous>, transform_indices = @transform_3, window_bounds = array<i64: 9, 128, 128>}, {pipeline_mode = #tpu.pipeline_mode<synchronous>, transform_indices = @transform_4, window_bounds = array<i64: 1, 128>}, {pipeline_mode = #tpu.pipeline_mode<synchronous>, transform_indices = @transform_5, window_bounds = array<i64: 128, 128>}, {pipeline_mode = #tpu.pipeline_mode<synchronous>, transform_indices = @transform_6, window_bounds = array<i64: 1, 128>}, {transform_indices = @transform_7, window_bounds = array<i64: 1, 8, 8, 128>}]} {
    %cst = arith.constant 0.000000e+00 : bf16
    %0 = vector.broadcast %cst : bf16 to vector<1x16x128xbf16>
    %c0 = arith.constant 0 : index
    %c0_0 = arith.constant 0 : index
    %c0_1 = arith.constant 0 : index
    %1 = vector.load %arg9[%c0, %c0_0, %c0_1] : memref<10x16x128xbf16, #tpu.memory_space<vmem>>, vector<1x16x128xbf16>
    tpu.vector_store %arg9[%c0, %c0_0, %c0_1], %0 {strides = array<i32>} : memref<10x16x128xbf16, #tpu.memory_space<vmem>>, vector<1x16x128xbf16>,
    %cst_2 = arith.constant 0.000000e+00 : bf16
    %2 = vector.broadcast %cst_2 : bf16 to vector<1x16x128xbf16>
    %c9 = arith.constant 9 : index
    %c0_3 = arith.constant 0 : index
    %c0_4 = arith.constant 0 : index
    %3 = vector.load %arg9[%c9, %c0_3, %c0_4] : memref<10x16x128xbf16, #tpu.memory_space<vmem>>, vector<1x16x128xbf16>
    tpu.vector_store %arg9[%c9, %c0_3, %c0_4], %2 {strides = array<i32>} : memref<10x16x128xbf16, #tpu.memory_space<vmem>>, vector<1x16x128xbf16>,
    %cst_5 = arith.constant 0.000000e+00 : bf16
    %4 = vector.broadcast %cst_5 : bf16 to vector<10x8x128xbf16>
    %c0_6 = arith.constant 0 : index
    %c8 = arith.constant 8 : index
    %c0_7 = arith.constant 0 : index
    %5 = vector.load %arg9[%c0_6, %c8, %c0_7] : memref<10x16x128xbf16, #tpu.memory_space<vmem>>, vector<10x8x128xbf16>
    tpu.vector_store %arg9[%c0_6, %c8, %c0_7], %4 {strides = array<i32>} : memref<10x16x128xbf16, #tpu.memory_space<vmem>>, vector<10x8x128xbf16>,
    %cst_8 = arith.constant 0.000000e+00 : f32
    %6 = vector.broadcast %cst_8 : f32 to vector<128x128xf32>
    %c0_9 = arith.constant 0 : index
    %c0_10 = arith.constant 0 : index
    %c0_11 = arith.constant 0 : index
    %c0_12 = arith.constant 0 : index
    %c0_13 = arith.constant 0 : index
    %7 = vector.load %arg1[%c0_9, %c0_10, %c0_11, %c0_12, %c0_13] : memref<1x4x9x16x128xbf16, #tpu.memory_space<vmem>>, vector<1x1x8x16x128xbf16>
    %8 = vector.shape_cast %7 : vector<1x1x8x16x128xbf16> to vector<8x16x128xbf16>
    %9 = vector.shape_cast %8 : vector<8x16x128xbf16> to vector<128x128xbf16>
    %c0_14 = arith.constant 0 : index
    %c1 = arith.constant 1 : index
    %c0_15 = arith.constant 0 : index
    %c0_16 = arith.constant 0 : index
    %c0_17 = arith.constant 0 : index
    %10 = vector.load %arg1[%c0_14, %c1, %c0_15, %c0_16, %c0_17] : memref<1x4x9x16x128xbf16, #tpu.memory_space<vmem>>, vector<1x1x8x16x128xbf16>
    %11 = vector.shape_cast %10 : vector<1x1x8x16x128xbf16> to vector<8x16x128xbf16>
    %12 = vector.shape_cast %11 : vector<8x16x128xbf16> to vector<128x128xbf16>
    %c0_18 = arith.constant 0 : index
    %c0_19 = arith.constant 0 : index
    %c0_20 = arith.constant 0 : index
    %13 = vector.load %arg2[%c0_18, %c0_19, %c0_20] : memref<9x128x128xbf16, #tpu.memory_space<vmem>>, vector<1x128x128xbf16>
    %14 = vector.shape_cast %13 : vector<1x128x128xbf16> to vector<128x128xbf16>
    %cst_21 = arith.constant dense<0.000000e+00> : vector<128x128xf32>
    %15 = tpu.matmul %9, %14, %cst_21 {dimension_numbers = #tpu.dot_dimension_numbers<[1], [0], [0], [1], [0, 0, 1, 1], [], []>} : vector<128x128xbf16>, vector<128x128xbf16>, vector<128x128xf32> -> vector<128x128xf32>
    %16 = arith.addf %6, %15 : vector<128x128xf32>
    %c1_22 = arith.constant 1 : index
    %c0_23 = arith.constant 0 : index
    %c0_24 = arith.constant 0 : index
    %17 = vector.load %arg2[%c1_22, %c0_23, %c0_24] : memref<9x128x128xbf16, #tpu.memory_space<vmem>>, vector<1x128x128xbf16>
    %18 = vector.shape_cast %17 : vector<1x128x128xbf16> to vector<128x128xbf16>
    %cst_25 = arith.constant dense<0.000000e+00> : vector<128x128xf32>
    %19 = tpu.matmul %12, %18, %cst_25 {dimension_numbers = #tpu.dot_dimension_numbers<[1], [0], [0], [1], [0, 0, 1, 1], [], []>} : vector<128x128xbf16>, vector<128x128xbf16>, vector<128x128xf32> -> vector<128x128xf32>
    %20 = arith.addf %16, %19 : vector<128x128xf32>
    %c2 = arith.constant 2 : index
    %c0_26 = arith.constant 0 : index
    %c0_27 = arith.constant 0 : index
    %21 = vector.load %arg2[%c2, %c0_26, %c0_27] : memref<9x128x128xbf16, #tpu.memory_space<vmem>>, vector<1x128x128xbf16>
    %22 = vector.shape_cast %21 : vector<1x128x128xbf16> to vector<128x128xbf16>
    %cst_28 = arith.constant dense<0.000000e+00> : vector<128x128xf32>
    %23 = tpu.matmul %9, %22, %cst_28 {dimension_numbers = #tpu.dot_dimension_numbers<[1], [0], [0], [1], [0, 0, 1, 1], [], []>} : vector<128x128xbf16>, vector<128x128xbf16>, vector<128x128xf32> -> vector<128x128xf32>
    %c127_i32 = arith.constant 127 : i32
    %24 = tpu.dynamic_rotate %23 by %c127_i32 dim 0 : vector<128x128xf32>, i32 -> vector<128x128xf32>
    %25 = arith.addf %20, %24 : vector<128x128xf32>
    %c0_29 = arith.constant 0 : index
    %c2_30 = arith.constant 2 : index
    %c0_31 = arith.constant 0 : index
    %c0_32 = arith.constant 0 : index
    %c0_33 = arith.constant 0 : index
    %26 = vector.load %arg1[%c0_29, %c2_30, %c0_31, %c0_32, %c0_33] : memref<1x4x9x16x128xbf16, #tpu.memory_space<vmem>>, vector<1x1x8x16x128xbf16>
    %27 = vector.shape_cast %26 : vector<1x1x8x16x128xbf16> to vector<8x16x128xbf16>
    %28 = vector.shape_cast %27 : vector<8x16x128xbf16> to vector<128x128xbf16>
    %c0_34 = arith.constant 0 : index
    %c3 = arith.constant 3 : index
    %c0_35 = arith.constant 0 : index
    %c0_36 = arith.constant 0 : index
    %c0_37 = arith.constant 0 : index
    %29 = vector.load %arg1[%c0_34, %c3, %c0_35, %c0_36, %c0_37] : memref<1x4x9x16x128xbf16, #tpu.memory_space<vmem>>, vector<1x1x8x16x128xbf16>
    %30 = vector.shape_cast %29 : vector<1x1x8x16x128xbf16> to vector<8x16x128xbf16>
    %31 = vector.shape_cast %30 : vector<8x16x128xbf16> to vector<128x128xbf16>
    %c3_38 = arith.constant 3 : index
    %c0_39 = arith.constant 0 : index
    %c0_40 = arith.constant 0 : index
    %32 = vector.load %arg2[%c3_38, %c0_39, %c0_40] : memref<9x128x128xbf16, #tpu.memory_space<vmem>>, vector<1x128x128xbf16>
    %33 = vector.shape_cast %32 : vector<1x128x128xbf16> to vector<128x128xbf16>
    %cst_41 = arith.constant dense<0.000000e+00> : vector<128x128xf32>
    %34 = tpu.matmul %28, %33, %cst_41 {dimension_numbers = #tpu.dot_dimension_numbers<[1], [0], [0], [1], [0, 0, 1, 1], [], []>} : vector<128x128xbf16>, vector<128x128xbf16>, vector<128x128xf32> -> vector<128x128xf32>
    %35 = arith.addf %25, %34 : vector<128x128xf32>
    %c4 = arith.constant 4 : index
    %c0_42 = arith.constant 0 : index
    %c0_43 = arith.constant 0 : index
    %36 = vector.load %arg2[%c4, %c0_42, %c0_43] : memref<9x128x128xbf16, #tpu.memory_space<vmem>>, vector<1x128x128xbf16>
    %37 = vector.shape_cast %36 : vector<1x128x128xbf16> to vector<128x128xbf16>
    %cst_44 = arith.constant dense<0.000000e+00> : vector<128x128xf32>
    %38 = tpu.matmul %31, %37, %cst_44 {dimension_numbers = #tpu.dot_dimension_numbers<[1], [0], [0], [1], [0, 0, 1, 1], [], []>} : vector<128x128xbf16>, vector<128x128xbf16>, vector<128x128xf32> -> vector<128x128xf32>
    %39 = arith.addf %35, %38 : vector<128x128xf32>
    %c5 = arith.constant 5 : index
    %c0_45 = arith.constant 0 : index
    %c0_46 = arith.constant 0 : index
    %40 = vector.load %arg2[%c5, %c0_45, %c0_46] : memref<9x128x128xbf16, #tpu.memory_space<vmem>>, vector<1x128x128xbf16>
    %41 = vector.shape_cast %40 : vector<1x128x128xbf16> to vector<128x128xbf16>
    %cst_47 = arith.constant dense<0.000000e+00> : vector<128x128xf32>
    %42 = tpu.matmul %28, %41, %cst_47 {dimension_numbers = #tpu.dot_dimension_numbers<[1], [0], [0], [1], [0, 0, 1, 1], [], []>} : vector<128x128xbf16>, vector<128x128xbf16>, vector<128x128xf32> -> vector<128x128xf32>
    %c127_i32_48 = arith.constant 127 : i32
    %43 = tpu.dynamic_rotate %42 by %c127_i32_48 dim 0 : vector<128x128xf32>, i32 -> vector<128x128xf32>
    %44 = arith.addf %39, %43 : vector<128x128xf32>
    %c0_49 = arith.constant 0 : index
    %c0_50 = arith.constant 0 : index
    %c1_51 = arith.constant 1 : index
    %c0_52 = arith.constant 0 : index
    %c0_53 = arith.constant 0 : index
    %45 = vector.load %arg1[%c0_49, %c0_50, %c1_51, %c0_52, %c0_53] : memref<1x4x9x16x128xbf16, #tpu.memory_space<vmem>>, vector<1x1x8x16x128xbf16>
    %46 = vector.shape_cast %45 : vector<1x1x8x16x128xbf16> to vector<8x16x128xbf16>
    %47 = vector.shape_cast %46 : vector<8x16x128xbf16> to vector<128x128xbf16>
    %c0_54 = arith.constant 0 : index
    %c1_55 = arith.constant 1 : index
    %c1_56 = arith.constant 1 : index
    %c0_57 = arith.constant 0 : index
    %c0_58 = arith.constant 0 : index
    %48 = vector.load %arg1[%c0_54, %c1_55, %c1_56, %c0_57, %c0_58] : memref<1x4x9x16x128xbf16, #tpu.memory_space<vmem>>, vector<1x1x8x16x128xbf16>
    %49 = vector.shape_cast %48 : vector<1x1x8x16x128xbf16> to vector<8x16x128xbf16>
    %50 = vector.shape_cast %49 : vector<8x16x128xbf16> to vector<128x128xbf16>
    %c6 = arith.constant 6 : index
    %c0_59 = arith.constant 0 : index
    %c0_60 = arith.constant 0 : index
    %51 = vector.load %arg2[%c6, %c0_59, %c0_60] : memref<9x128x128xbf16, #tpu.memory_space<vmem>>, vector<1x128x128xbf16>
    %52 = vector.shape_cast %51 : vector<1x128x128xbf16> to vector<128x128xbf16>
    %cst_61 = arith.constant dense<0.000000e+00> : vector<128x128xf32>
    %53 = tpu.matmul %47, %52, %cst_61 {dimension_numbers = #tpu.dot_dimension_numbers<[1], [0], [0], [1], [0, 0, 1, 1], [], []>} : vector<128x128xbf16>, vector<128x128xbf16>, vector<128x128xf32> -> vector<128x128xf32>
    %54 = arith.addf %44, %53 : vector<128x128xf32>
    %c7 = arith.constant 7 : index
    %c0_62 = arith.constant 0 : index
    %c0_63 = arith.constant 0 : index
    %55 = vector.load %arg2[%c7, %c0_62, %c0_63] : memref<9x128x128xbf16, #tpu.memory_space<vmem>>, vector<1x128x128xbf16>
    %56 = vector.shape_cast %55 : vector<1x128x128xbf16> to vector<128x128xbf16>
    %cst_64 = arith.constant dense<0.000000e+00> : vector<128x128xf32>
    %57 = tpu.matmul %50, %56, %cst_64 {dimension_numbers = #tpu.dot_dimension_numbers<[1], [0], [0], [1], [0, 0, 1, 1], [], []>} : vector<128x128xbf16>, vector<128x128xbf16>, vector<128x128xf32> -> vector<128x128xf32>
    %58 = arith.addf %54, %57 : vector<128x128xf32>
    %c8_65 = arith.constant 8 : index
    %c0_66 = arith.constant 0 : index
    %c0_67 = arith.constant 0 : index
    %59 = vector.load %arg2[%c8_65, %c0_66, %c0_67] : memref<9x128x128xbf16, #tpu.memory_space<vmem>>, vector<1x128x128xbf16>
    %60 = vector.shape_cast %59 : vector<1x128x128xbf16> to vector<128x128xbf16>
    %cst_68 = arith.constant dense<0.000000e+00> : vector<128x128xf32>
    %61 = tpu.matmul %47, %60, %cst_68 {dimension_numbers = #tpu.dot_dimension_numbers<[1], [0], [0], [1], [0, 0, 1, 1], [], []>} : vector<128x128xbf16>, vector<128x128xbf16>, vector<128x128xf32> -> vector<128x128xf32>
    %c127_i32_69 = arith.constant 127 : i32
    %62 = tpu.dynamic_rotate %61 by %c127_i32_69 dim 0 : vector<128x128xf32>, i32 -> vector<128x128xf32>
    %63 = arith.addf %58, %62 : vector<128x128xf32>
    %c0_70 = arith.constant 0 : index
    %c0_71 = arith.constant 0 : index
    %64 = vector.load %arg3[%c0_70, %c0_71] : memref<1x128xf32, #tpu.memory_space<vmem>>, vector<1x128xf32>
    %65 = vector.broadcast %64 : vector<1x128xf32> to vector<128x128xf32>
    %66 = arith.addf %63, %65 : vector<128x128xf32>
    %cst_72 = arith.constant 0.000000e+00 : f32
    %67 = vector.broadcast %cst_72 : f32 to vector<128x128xf32>
    %68 = arith.maximumf %66, %67 : vector<128x128xf32>
    %69 = vector.shape_cast %68 : vector<128x128xf32> to vector<8x16x128xf32>
    %70 = vector.extract_strided_slice %69 {offsets = [0, 0, 0], sizes = [8, 8, 128], strides = [1, 1, 1]} : vector<8x16x128xf32> to vector<8x8x128xf32>
    %71 = arith.truncf %70 : vector<8x8x128xf32> to vector<8x8x128xbf16>
    %c1_73 = arith.constant 1 : index
    %c0_74 = arith.constant 0 : index
    %c0_75 = arith.constant 0 : index
    %72 = vector.load %arg9[%c1_73, %c0_74, %c0_75] : memref<10x16x128xbf16, #tpu.memory_space<vmem>>, vector<8x8x128xbf16>
    tpu.vector_store %arg9[%c1_73, %c0_74, %c0_75], %71 {strides = array<i32>} : memref<10x16x128xbf16, #tpu.memory_space<vmem>>, vector<8x8x128xbf16>,
    %c0_76 = arith.constant 0 : index
    %c3_77 = arith.constant 3 : index
    %c0_78 = arith.constant 0 : index
    %c0_79 = arith.constant 0 : index
    %c0_80 = arith.constant 0 : index
    %73 = vector.load %arg1[%c0_76, %c3_77, %c0_78, %c0_79, %c0_80] : memref<1x4x9x16x128xbf16, #tpu.memory_space<vmem>>, vector<1x1x8x16x128xbf16>
    %74 = vector.shape_cast %73 : vector<1x1x8x16x128xbf16> to vector<8x16x128xbf16>
    %75 = vector.shape_cast %74 : vector<8x16x128xbf16> to vector<128x128xbf16>
    %c0_81 = arith.constant 0 : index
    %c0_82 = arith.constant 0 : index
    %76 = vector.load %arg6[%c0_81, %c0_82] : memref<128x128xbf16, #tpu.memory_space<vmem>>, vector<128x128xbf16>
    %cst_83 = arith.constant dense<0.000000e+00> : vector<128x128xf32>
    %77 = tpu.matmul %75, %76, %cst_83 {dimension_numbers = #tpu.dot_dimension_numbers<[1], [0], [0], [1], [0, 0, 1, 1], [], []>} : vector<128x128xbf16>, vector<128x128xbf16>, vector<128x128xf32> -> vector<128x128xf32>
    %c0_84 = arith.constant 0 : index
    %c0_85 = arith.constant 0 : index
    %78 = vector.load %arg7[%c0_84, %c0_85] : memref<1x128xf32, #tpu.memory_space<vmem>>, vector<1x128xf32>
    %79 = vector.broadcast %78 : vector<1x128xf32> to vector<128x128xf32>
    %80 = arith.addf %77, %79 : vector<128x128xf32>
    %cst_86 = arith.constant 0.000000e+00 : f32
    %81 = vector.broadcast %cst_86 : f32 to vector<128x128xf32>
    %c0_87 = arith.constant 0 : index
    %c0_88 = arith.constant 0 : index
    %c0_89 = arith.constant 0 : index
    %82 = vector.load %arg9[%c0_87, %c0_88, %c0_89] : memref<10x16x128xbf16, #tpu.memory_space<vmem>>, vector<8x16x128xbf16>
    %83 = vector.shape_cast %82 : vector<8x16x128xbf16> to vector<128x128xbf16>
    %c0_90 = arith.constant 0 : index
    %c0_91 = arith.constant 0 : index
    %c0_92 = arith.constant 0 : index
    %84 = vector.load %arg4[%c0_90, %c0_91, %c0_92] : memref<9x128x128xbf16, #tpu.memory_space<vmem>>, vector<1x128x128xbf16>
    %85 = vector.shape_cast %84 : vector<1x128x128xbf16> to vector<128x128xbf16>
    %cst_93 = arith.constant dense<0.000000e+00> : vector<128x128xf32>
    %86 = tpu.matmul %83, %85, %cst_93 {dimension_numbers = #tpu.dot_dimension_numbers<[1], [0], [0], [1], [0, 0, 1, 1], [], []>} : vector<128x128xbf16>, vector<128x128xbf16>, vector<128x128xf32> -> vector<128x128xf32>
    %c1_i32 = arith.constant 1 : i32
    %87 = tpu.dynamic_rotate %86 by %c1_i32 dim 0 : vector<128x128xf32>, i32 -> vector<128x128xf32>
    %88 = arith.addf %81, %87 : vector<128x128xf32>
    %c1_94 = arith.constant 1 : index
    %c0_95 = arith.constant 0 : index
    %c0_96 = arith.constant 0 : index
    %89 = vector.load %arg4[%c1_94, %c0_95, %c0_96] : memref<9x128x128xbf16, #tpu.memory_space<vmem>>, vector<1x128x128xbf16>
    %90 = vector.shape_cast %89 : vector<1x128x128xbf16> to vector<128x128xbf16>
    %cst_97 = arith.constant dense<0.000000e+00> : vector<128x128xf32>
    %91 = tpu.matmul %83, %90, %cst_97 {dimension_numbers = #tpu.dot_dimension_numbers<[1], [0], [0], [1], [0, 0, 1, 1], [], []>} : vector<128x128xbf16>, vector<128x128xbf16>, vector<128x128xf32> -> vector<128x128xf32>
    %92 = arith.addf %88, %91 : vector<128x128xf32>
    %c2_98 = arith.constant 2 : index
    %c0_99 = arith.constant 0 : index
    %c0_100 = arith.constant 0 : index
    %93 = vector.load %arg4[%c2_98, %c0_99, %c0_100] : memref<9x128x128xbf16, #tpu.memory_space<vmem>>, vector<1x128x128xbf16>
    %94 = vector.shape_cast %93 : vector<1x128x128xbf16> to vector<128x128xbf16>
    %cst_101 = arith.constant dense<0.000000e+00> : vector<128x128xf32>
    %95 = tpu.matmul %83, %94, %cst_101 {dimension_numbers = #tpu.dot_dimension_numbers<[1], [0], [0], [1], [0, 0, 1, 1], [], []>} : vector<128x128xbf16>, vector<128x128xbf16>, vector<128x128xf32> -> vector<128x128xf32>
    %c127_i32_102 = arith.constant 127 : i32
    %96 = tpu.dynamic_rotate %95 by %c127_i32_102 dim 0 : vector<128x128xf32>, i32 -> vector<128x128xf32>
    %97 = arith.addf %92, %96 : vector<128x128xf32>
    %c1_103 = arith.constant 1 : index
    %c0_104 = arith.constant 0 : index
    %c0_105 = arith.constant 0 : index
    %98 = vector.load %arg9[%c1_103, %c0_104, %c0_105] : memref<10x16x128xbf16, #tpu.memory_space<vmem>>, vector<8x16x128xbf16>
    %99 = vector.shape_cast %98 : vector<8x16x128xbf16> to vector<128x128xbf16>
    %c3_106 = arith.constant 3 : index
    %c0_107 = arith.constant 0 : index
    %c0_108 = arith.constant 0 : index
    %100 = vector.load %arg4[%c3_106, %c0_107, %c0_108] : memref<9x128x128xbf16, #tpu.memory_space<vmem>>, vector<1x128x128xbf16>
    %101 = vector.shape_cast %100 : vector<1x128x128xbf16> to vector<128x128xbf16>
    %cst_109 = arith.constant dense<0.000000e+00> : vector<128x128xf32>
    %102 = tpu.matmul %99, %101, %cst_109 {dimension_numbers = #tpu.dot_dimension_numbers<[1], [0], [0], [1], [0, 0, 1, 1], [], []>} : vector<128x128xbf16>, vector<128x128xbf16>, vector<128x128xf32> -> vector<128x128xf32>
    %c1_i32_110 = arith.constant 1 : i32
    %103 = tpu.dynamic_rotate %102 by %c1_i32_110 dim 0 : vector<128x128xf32>, i32 -> vector<128x128xf32>
    %104 = arith.addf %97, %103 : vector<128x128xf32>
    %c4_111 = arith.constant 4 : index
    %c0_112 = arith.constant 0 : index
    %c0_113 = arith.constant 0 : index
    %105 = vector.load %arg4[%c4_111, %c0_112, %c0_113] : memref<9x128x128xbf16, #tpu.memory_space<vmem>>, vector<1x128x128xbf16>
    %106 = vector.shape_cast %105 : vector<1x128x128xbf16> to vector<128x128xbf16>
    %cst_114 = arith.constant dense<0.000000e+00> : vector<128x128xf32>
    %107 = tpu.matmul %99, %106, %cst_114 {dimension_numbers = #tpu.dot_dimension_numbers<[1], [0], [0], [1], [0, 0, 1, 1], [], []>} : vector<128x128xbf16>, vector<128x128xbf16>, vector<128x128xf32> -> vector<128x128xf32>
    %108 = arith.addf %104, %107 : vector<128x128xf32>
    %c5_115 = arith.constant 5 : index
    %c0_116 = arith.constant 0 : index
    %c0_117 = arith.constant 0 : index
    %109 = vector.load %arg4[%c5_115, %c0_116, %c0_117] : memref<9x128x128xbf16, #tpu.memory_space<vmem>>, vector<1x128x128xbf16>
    %110 = vector.shape_cast %109 : vector<1x128x128xbf16> to vector<128x128xbf16>
    %cst_118 = arith.constant dense<0.000000e+00> : vector<128x128xf32>
    %111 = tpu.matmul %99, %110, %cst_118 {dimension_numbers = #tpu.dot_dimension_numbers<[1], [0], [0], [1], [0, 0, 1, 1], [], []>} : vector<128x128xbf16>, vector<128x128xbf16>, vector<128x128xf32> -> vector<128x128xf32>
    %c127_i32_119 = arith.constant 127 : i32
    %112 = tpu.dynamic_rotate %111 by %c127_i32_119 dim 0 : vector<128x128xf32>, i32 -> vector<128x128xf32>
    %113 = arith.addf %108, %112 : vector<128x128xf32>
    %c2_120 = arith.constant 2 : index
    %c0_121 = arith.constant 0 : index
    %c0_122 = arith.constant 0 : index
    %114 = vector.load %arg9[%c2_120, %c0_121, %c0_122] : memref<10x16x128xbf16, #tpu.memory_space<vmem>>, vector<8x16x128xbf16>
    %115 = vector.shape_cast %114 : vector<8x16x128xbf16> to vector<128x128xbf16>
    %c6_123 = arith.constant 6 : index
    %c0_124 = arith.constant 0 : index
    %c0_125 = arith.constant 0 : index
    %116 = vector.load %arg4[%c6_123, %c0_124, %c0_125] : memref<9x128x128xbf16, #tpu.memory_space<vmem>>, vector<1x128x128xbf16>
    %117 = vector.shape_cast %116 : vector<1x128x128xbf16> to vector<128x128xbf16>
    %cst_126 = arith.constant dense<0.000000e+00> : vector<128x128xf32>
    %118 = tpu.matmul %115, %117, %cst_126 {dimension_numbers = #tpu.dot_dimension_numbers<[1], [0], [0], [1], [0, 0, 1, 1], [], []>} : vector<128x128xbf16>, vector<128x128xbf16>, vector<128x128xf32> -> vector<128x128xf32>
    %c1_i32_127 = arith.constant 1 : i32
    %119 = tpu.dynamic_rotate %118 by %c1_i32_127 dim 0 : vector<128x128xf32>, i32 -> vector<128x128xf32>
    %120 = arith.addf %113, %119 : vector<128x128xf32>
    %c7_128 = arith.constant 7 : index
    %c0_129 = arith.constant 0 : index
    %c0_130 = arith.constant 0 : index
    %121 = vector.load %arg4[%c7_128, %c0_129, %c0_130] : memref<9x128x128xbf16, #tpu.memory_space<vmem>>, vector<1x128x128xbf16>
    %122 = vector.shape_cast %121 : vector<1x128x128xbf16> to vector<128x128xbf16>
    %cst_131 = arith.constant dense<0.000000e+00> : vector<128x128xf32>
    %123 = tpu.matmul %115, %122, %cst_131 {dimension_numbers = #tpu.dot_dimension_numbers<[1], [0], [0], [1], [0, 0, 1, 1], [], []>} : vector<128x128xbf16>, vector<128x128xbf16>, vector<128x128xf32> -> vector<128x128xf32>
    %124 = arith.addf %120, %123 : vector<128x128xf32>
    %c8_132 = arith.constant 8 : index
    %c0_133 = arith.constant 0 : index
    %c0_134 = arith.constant 0 : index
    %125 = vector.load %arg4[%c8_132, %c0_133, %c0_134] : memref<9x128x128xbf16, #tpu.memory_space<vmem>>, vector<1x128x128xbf16>
    %126 = vector.shape_cast %125 : vector<1x128x128xbf16> to vector<128x128xbf16>
    %cst_135 = arith.constant dense<0.000000e+00> : vector<128x128xf32>
    %127 = tpu.matmul %115, %126, %cst_135 {dimension_numbers = #tpu.dot_dimension_numbers<[1], [0], [0], [1], [0, 0, 1, 1], [], []>} : vector<128x128xbf16>, vector<128x128xbf16>, vector<128x128xf32> -> vector<128x128xf32>
    %c127_i32_136 = arith.constant 127 : i32
    %128 = tpu.dynamic_rotate %127 by %c127_i32_136 dim 0 : vector<128x128xf32>, i32 -> vector<128x128xf32>
    %129 = arith.addf %124, %128 : vector<128x128xf32>
    %c0_137 = arith.constant 0 : index
    %c0_138 = arith.constant 0 : index
    %130 = vector.load %arg5[%c0_137, %c0_138] : memref<1x128xf32, #tpu.memory_space<vmem>>, vector<1x128xf32>
    %131 = vector.broadcast %130 : vector<1x128xf32> to vector<128x128xf32>
    %132 = arith.addf %129, %131 : vector<128x128xf32>
    %133 = arith.addf %132, %80 : vector<128x128xf32>
    %cst_139 = arith.constant 0.000000e+00 : f32
    %134 = vector.broadcast %cst_139 : f32 to vector<128x128xf32>
    %135 = arith.maximumf %133, %134 : vector<128x128xf32>
    %136 = vector.shape_cast %135 : vector<128x128xf32> to vector<8x16x128xf32>
    %137 = vector.extract_strided_slice %136 {offsets = [0, 0, 0], sizes = [8, 8, 128], strides = [1, 1, 1]} : vector<8x16x128xf32> to vector<8x8x128xf32>
    %c0_140 = arith.constant 0 : index
    %c0_141 = arith.constant 0 : index
    %c0_142 = arith.constant 0 : index
    %c0_143 = arith.constant 0 : index
    %138 = vector.load %arg8[%c0_140, %c0_141, %c0_142, %c0_143] : memref<1x8x8x128xf32, #tpu.memory_space<vmem>>, vector<1x8x8x128xf32>
    %139 = vector.shape_cast %138 : vector<1x8x8x128xf32> to vector<8x8x128xf32>
    %140 = vector.shape_cast %137 : vector<8x8x128xf32> to vector<1x8x8x128xf32>
    tpu.vector_store %arg8[%c0_140, %c0_141, %c0_142, %c0_143], %140 {strides = array<i32>} : memref<1x8x8x128xf32, #tpu.memory_space<vmem>>, vector<1x8x8x128xf32>,
    return
  }
  func.func @transform_0(%arg0: i32) -> (i32, i32, i32, i32, i32) {
    %c0_i32 = arith.constant 0 : i32
    %c0_i32_0 = arith.constant 0 : i32
    %c0_i32_1 = arith.constant 0 : i32
    %c0_i32_2 = arith.constant 0 : i32
    %c0_i32_3 = arith.constant 0 : i32
    return %arg0, %c0_i32, %c0_i32_0, %c0_i32_1, %c0_i32_2 : i32, i32, i32, i32, i32
  }
  func.func @transform_1(%arg0: i32) -> (i32, i32, i32) {
    %c0_i32 = arith.constant 0 : i32
    %c0_i32_0 = arith.constant 0 : i32
    %c0_i32_1 = arith.constant 0 : i32
    %c0_i32_2 = arith.constant 0 : i32
    return %c0_i32, %c0_i32_0, %c0_i32_1 : i32, i32, i32
  }
  func.func @transform_2(%arg0: i32) -> (i32, i32) {
    %c0_i32 = arith.constant 0 : i32
    %c0_i32_0 = arith.constant 0 : i32
    %c0_i32_1 = arith.constant 0 : i32
    return %c0_i32, %c0_i32_0 : i32, i32
  }
  func.func @transform_3(%arg0: i32) -> (i32, i32, i32) {
    %c0_i32 = arith.constant 0 : i32
    %c0_i32_0 = arith.constant 0 : i32
    %c0_i32_1 = arith.constant 0 : i32
    %c0_i32_2 = arith.constant 0 : i32
    return %c0_i32, %c0_i32_0, %c0_i32_1 : i32, i32, i32
  }
  func.func @transform_4(%arg0: i32) -> (i32, i32) {
    %c0_i32 = arith.constant 0 : i32
    %c0_i32_0 = arith.constant 0 : i32
    %c0_i32_1 = arith.constant 0 : i32
    return %c0_i32, %c0_i32_0 : i32, i32
  }
  func.func @transform_5(%arg0: i32) -> (i32, i32) {
    %c0_i32 = arith.constant 0 : i32
    %c0_i32_0 = arith.constant 0 : i32
    %c0_i32_1 = arith.constant 0 : i32
    return %c0_i32, %c0_i32_0 : i32, i32
  }
  func.func @transform_6(%arg0: i32) -> (i32, i32) {
    %c0_i32 = arith.constant 0 : i32
    %c0_i32_0 = arith.constant 0 : i32
    %c0_i32_1 = arith.constant 0 : i32
    return %c0_i32, %c0_i32_0 : i32, i32
  }
  func.func @transform_7(%arg0: i32) -> (i32, i32, i32, i32) {
    %c0_i32 = arith.constant 0 : i32
    %c0_i32_0 = arith.constant 0 : i32
    %c0_i32_1 = arith.constant 0 : i32
    %c0_i32_2 = arith.constant 0 : i32
    return %arg0, %c0_i32, %c0_i32_0, %c0_i32_1 : i32, i32, i32, i32
  }
}

</mosaic_0001>

<bundles_post_ra>
// kernel: residual_block_forward.1
= control target key start
LH: loop header
LB: loop body
LE: loop exit
PB: predicated region body
PF: predicated region fallthrough
CT: control target
= control target key end

     0   :  { %s6242_s24 = smov 0   ;;  %s7480_s0 = inlined_call_operand.vmem [shape: bf16[2,4,9,16,128], index: 0, kind: input, shape index: {}]   ;;  %s7481_s1 = inlined_call_operand.vmem [shape: bf16[9,128,128], index: 1, kind: input, shape index: {}]   ;;  %s7482_s2 = inlined_call_operand.vmem [shape: f32[1,128], index: 2, kind: input, shape index: {}]   ;;  %s7483_s3 = inlined_call_operand.vmem [shape: bf16[9,128,128], index: 3, kind: input, shape index: {}]   ;;  %s7484_s4 = inlined_call_operand.vmem [shape: f32[1,128], index: 4, kind: input, shape index: {}]   ;;  %s7485_s5 = inlined_call_operand.vmem [shape: bf16[128,128], index: 5, kind: input, shape index: {}]   ;;  %s7486_s6 = inlined_call_operand.vmem [shape: f32[1,128], index: 6, kind: input, shape index: {}]   ;;  %s7487_s7 = inlined_call_operand.vmem [shape: f32[2,8,8,128], index: 7, kind: output, shape index: {}]  }
   0x1 LB: > { %s4425_s25 = sadd.s32 4294967295, %s6199_s24   ;;  %p4429_p0 = scmp.ge.s32.totalorder %s6199_s24, 1  ;;  %s6199_s24 = sphi %s6242_s24, %s17_s24  }
   0x2   : > { %p237_p1 = scmp.lt.s32.totalorder %s6199_s24, 3 }
   0x4   : > { %p238_p2 = pnand %p4429_p0, %p237_p1 }
   0x5   : > { %p269_p3 = scmp.lt.s32.totalorder (!%p238_p2), %s4425_s25, 1 }
   0x6   : > { %241 = sbr.rel (%p238_p2) target bundleno = 742 (0x2e6), region = 48 }
   0xb   : > { %v5961_v0 = vld [vmem:[%s7481_s1 + $0x78] sm:$0xff]   ;;  %v5963_v2 = vld [vmem:[%s7481_s1 + $0x70] sm:$0xff]   ;;  %v5965_v4 = vld [vmem:[%s7481_s1 + $0x68] sm:$0xff]   ;;  %s7489_s25 = smov (!%p269_p3, %s4425_s25), 1 }
   0xc   : > { %v5962_v1 = vld [vmem:[%s7481_s1 + $0x38] sm:$0xff]   ;;  %5327 = vmatprep.subr.bf16.mxu0 %v5961_v0  ;;  %v5964_v3 = vld [vmem:[%s7481_s1 + $0x30] sm:$0xff]   ;;  %v5966_v5 = vld [vmem:[%s7481_s1 + $0x28] sm:$0xff]   ;;  %s5951_s19 = smul.u32 288, %s7489_s25 }
   0xd   : > { %5359 = vmatprep.subr.bf16.mxu1 %v5962_v1  ;;  %5328 = vmatpush3.bf16.msra.mxu0 %v5961_v0  ;;  %v5967_v6 = vld [vmem:[%s7481_s1 + $0x60] sm:$0xff]   ;;  %v5969_v8 = vld [vmem:[%s7481_s1 + $0x58] sm:$0xff]   ;;  %v5971_v10 = vld [vmem:[%s7481_s1 + $0x50] sm:$0xff]  }
   0xe   : > { %5360 = vmatpush3.bf16.msra.mxu1 %v5962_v1  ;;  %5329 = vmatprep.subr.bf16.mxu0 %v5963_v2  ;;  %v5968_v7 = vld [vmem:[%s7481_s1 + $0x20] sm:$0xff]   ;;  %v5970_v9 = vld [vmem:[%s7481_s1 + $0x18] sm:$0xff]   ;;  %s6286_s28 = scalar_lea.vmem %s7480_s0, %s5951_s19  ;;  %v5972_v11 = vld [vmem:[%s7481_s1 + $0x10] sm:$0xff]  }
   0xf   : > { %5361 = vmatprep.subr.bf16.mxu1 %v5964_v3  ;;  %v5977_v12 = vld [vmem:[%s6286_s28 + $0x48] sm:$0xff]   ;;  %v6296_v13 = vld [vmem:[%s6286_s28] sm:$0xff]   ;;  %v5979_v18 = vld [vmem:[%s6286_s28 + $0x50] sm:$0xff]  }
  0x10   : > { %5343 = vmatprep.mubr.bf16.mxu0 %v5977_v12  ;;  %5375 = vmatprep.mubr.bf16.mxu1 %v6296_v13  ;;  %v5973_v14 = vld [vmem:[%s7481_s1 + $0x48] sm:$0xff]   ;;  %v5975_v16 = vld [vmem:[%s7481_s1 + $0x40] sm:$0xff]   ;;  %v5981_v19 = vld [vmem:[%s7481_s1 + $0xb8] sm:$0xff]  }
  0x11   : > { %5330 = vmatpush3.bf16.msra.mxu0 %v5963_v2  ;;  %v5974_v15 = vld [vmem:[%s7481_s1 + $0x8] sm:$0xff]   ;;  %v5976_v17 = vld [vmem:[%s7481_s1] sm:$0xff]   ;;  %v5982_v20 = vld [vmem:[%s7481_s1 + $0xf8] sm:$0xff]  }
  0x12   : > { %5362 = vmatpush3.bf16.msra.mxu1 %v5964_v3  ;;  %5331 = vmatprep.subr.bf16.mxu0 %v5965_v4  ;;  %v6319_v21 = vld [vmem:[%s6286_s28 + $0x8] sm:$0xff]   ;;  %v5983_v22 = vld [vmem:[%s7481_s1 + $0xb0] sm:$0xff]   ;;  %v5985_v24 = vld [vmem:[%s6286_s28 + $0x58] sm:$0xff]  }
  0x13   : > { %5363 = vmatprep.subr.bf16.mxu1 %v5966_v5  ;;  %v5984_v23 = vld [vmem:[%s7481_s1 + $0xf0] sm:$0xff]   ;;  %v5987_v26 = vld [vmem:[%s6286_s28 + $0x60] sm:$0xff]   ;;  %v5989_v27 = vld [vmem:[%s7481_s1 + $0xa8] sm:$0xff]  }
  0x14   : > { %v6329_v25 = vld [vmem:[%s6286_s28 + $0x10] sm:$0xff]   ;;  %v5990_v28 = vld [vmem:[%s7481_s1 + $0xe8] sm:$0xff]   ;;  %v6341_v29 = vld [vmem:[%s6286_s28 + $0x18] sm:$0xff]  }
  0x15   : > { %5332 = vmatpush3.bf16.msra.mxu0 %v5965_v4  ;;  %v5991_v30 = vld [vmem:[%s7481_s1 + $0xa0] sm:$0xff]   ;;  %v5993_v32 = vld [vmem:[%s6286_s28 + $0x68] sm:$0xff]   ;;  %v5995_v34 = vld [vmem:[%s6286_s28 + $0x70] sm:$0xff]  }
  0x16   : > { %5364 = vmatpush3.bf16.msra.mxu1 %v5966_v5  ;;  %5333 = vmatprep.subr.bf16.mxu0 %v5967_v6  ;;  %v5992_v31 = vld [vmem:[%s7481_s1 + $0xe0] sm:$0xff]   ;;  %v5997_v35 = vld [vmem:[%s7481_s1 + $0x98] sm:$0xff]   ;;  %v6363_v37 = vld [vmem:[%s6286_s28 + $0x28] sm:$0xff]  }
  0x17   : > { %5365 = vmatprep.subr.bf16.mxu1 %v5968_v7  ;;  %v6351_v33 = vld [vmem:[%s6286_s28 + $0x20] sm:$0xff]   ;;  %v5998_v36 = vld [vmem:[%s7481_s1 + $0xd8] sm:$0xff]   ;;  %v5999_v38 = vld [vmem:[%s7481_s1 + $0x90] sm:$0xff]  }
  0x18   : > { %v6000_v39 = vld [vmem:[%s7481_s1 + $0xd0] sm:$0xff]   ;;  %v6001_v40 = vld [vmem:[%s6286_s28 + $0x78] sm:$0xff]   ;;  %v6005_v42 = vld [vmem:[%s7481_s1 + $0x88] sm:$0xff]  }
  0x19   : > { %5334 = vmatpush3.bf16.msra.mxu0 %v5967_v6  ;;  %v6373_v41 = vld [vmem:[%s6286_s28 + $0x30] sm:$0xff]   ;;  %v6006_v43 = vld [vmem:[%s7481_s1 + $0xc8] sm:$0xff]   ;;  %v6003_v44 = vld [vmem:[%s6286_s28 + $0x80] sm:$0xff]  }
  0x1a   : > { %5366 = vmatpush3.bf16.msra.mxu1 %v5968_v7  ;;  %5335 = vmatprep.subr.bf16.mxu0 %v5969_v8  ;;  %v6385_v45 = vld [vmem:[%s6286_s28 + $0x38] sm:$0xff]   ;;  %v6007_v46 = vld [vmem:[%s7481_s1 + $0x80] sm:$0xff]   ;;  %v6394_v48 = vld [vmem:[%s6286_s28 + $0x90] sm:$0xff]  }
  0x1b   : > { %5367 = vmatprep.subr.bf16.mxu1 %v5970_v9  ;;  %v6008_v47 = vld [vmem:[%s7481_s1 + $0xc0] sm:$0xff]   ;;  %v6011_v49 = vld [vmem:[%s7481_s1 + $0x138] sm:$0xff]   ;;  %v6013_v52 = vld [vmem:[%s7481_s1 + $0x130] sm:$0xff]  }
  0x1c   : > { %v6012_v50 = vld [vmem:[%s7481_s1 + $0x178] sm:$0xff]   ;;  %v6014_v53 = vld [vmem:[%s7481_s1 + $0x170] sm:$0xff]   ;;  %v6416_v54 = vld [vmem:[%s6286_s28 + $0xa0] sm:$0xff]  }
  0x1d   : > { %5336 = vmatpush3.bf16.msra.mxu0 %v5969_v8  ;;  %v6406_v51 = vld [vmem:[%s6286_s28 + $0x98] sm:$0xff]   ;;  %v6017_v55 = vld [vmem:[%s7481_s1 + $0x128] sm:$0xff]   ;;  %v6019_v58 = vld [vmem:[%s7481_s1 + $0x120] sm:$0xff]  }
  0x1e   : > { %5368 = vmatpush3.bf16.msra.mxu1 %v5970_v9  ;;  %5337 = vmatprep.subr.bf16.mxu0 %v5971_v10  ;;  %v6018_v56 = vld [vmem:[%s7481_s1 + $0x168] sm:$0xff]   ;;  %v6020_v59 = vld [vmem:[%s7481_s1 + $0x160] sm:$0xff]   ;;  %v6438_v60 = vld [vmem:[%s6286_s28 + $0xb0] sm:$0xff]  }
  0x1f   : > { %5369 = vmatprep.subr.bf16.mxu1 %v5972_v11  ;;  %v6428_v57 = vld [vmem:[%s6286_s28 + $0xa8] sm:$0xff]   ;;  %v6023_v61 = vld [vmem:[%s7481_s1 + $0x118] sm:$0xff]   ;;  %v6025_v0 = vld [vmem:[%s7481_s1 + $0x110] sm:$0xff]  }
  0x20   : > { %v6024_v62 = vld [vmem:[%s7481_s1 + $0x158] sm:$0xff]   ;;  %v6026_v1 = vld [vmem:[%s7481_s1 + $0x150] sm:$0xff]   ;;  %v6460_v2 = vld [vmem:[%s6286_s28 + $0xc0] sm:$0xff]  }
  0x21   : > { %5338 = vmatpush3.bf16.msra.mxu0 %v5971_v10  ;;  %v6450_v63 = vld [vmem:[%s6286_s28 + $0xb8] sm:$0xff]   ;;  %v6029_v3 = vld [vmem:[%s7481_s1 + $0x108] sm:$0xff]   ;;  %v6031_v6 = vld [vmem:[%s7481_s1 + $0x100] sm:$0xff]  }
  0x22   : > { %5370 = vmatpush3.bf16.msra.mxu1 %v5972_v11  ;;  %5339 = vmatprep.subr.bf16.mxu0 %v5973_v14  ;;  %v6030_v4 = vld [vmem:[%s7481_s1 + $0x148] sm:$0xff]   ;;  %v6032_v7 = vld [vmem:[%s7481_s1 + $0x140] sm:$0xff]   ;;  %v6033_v8 = vld [vmem:[%s6286_s28 + $0xd8] sm:$0xff]  }
  0x23   : > { %5371 = vmatprep.subr.bf16.mxu1 %v5974_v15  ;;  %v6472_v5 = vld [vmem:[%s6286_s28 + $0xc8] sm:$0xff]   ;;  %v6035_v9 = vld [vmem:[%s7481_s1 + $0x1b8] sm:$0xff]   ;;  %v6034_v11 = vld [vmem:[%s6286_s28 + $0xe0] sm:$0xff]  }
  0x24   : > { %v6036_v10 = vld [vmem:[%s7481_s1 + $0x1f8] sm:$0xff]   ;;  %v6037_v12 = vld [vmem:[%s7481_s1 + $0x1b0] sm:$0xff]  }
  0x25   : > { %5340 = vmatpush3.bf16.msra.mxu0 %v5973_v14  ;;  %v6039_v14 = vld [vmem:[%s6286_s28 + $0xe8] sm:$0xff]  }
  0x26   : > { %5372 = vmatpush3.bf16.msra.mxu1 %v5974_v15  ;;  %5341 = vmatprep.subr.bf16.mxu0 %v5975_v16  ;;  %v6041_v15 = vld [vmem:[%s7481_s1 + $0x1a8] sm:$0xff]  }
  0x27   : > { %5373 = vmatprep.subr.bf16.mxu1 %v5976_v17 }
  0x29   : > { %5342 = vmatpush3.bf16.msra.mxu0 %v5975_v16  ;;  %v6042_v16 = vld [vmem:[%s7481_s1 + $0x1e8] sm:$0xff]  }
  0x2a   : > { %5374 = vmatpush3.bf16.msra.mxu1 %v5976_v17  ;;  %5391 = vmatprep.subr.bf16.mxu0 %v5981_v19  ;;  %v6040_v17 = vld [vmem:[%s6286_s28 + $0xf0] sm:$0xff]  }
  0x2b   : > { %5423 = vmatprep.subr.bf16.mxu1 %v5982_v20 }
  0x2c   : > { %5344 = vmatmul.mubr.bf16.vlgmr.msra.gmra.mxu0 %v5979_v18  ;;  %v6043_v18 = vld [vmem:[%s7481_s1 + $0x1a0] sm:$0xff]  }
  0x2d   : > { %5376 = vmatmul.mubr.bf16.vlgmr.msra.gmra.mxu1 %v6319_v21  ;;  %5392 = vmatpush3.bf16.msra.mxu0 %v5981_v19  ;;  %v6044_v19 = vld [vmem:[%s7481_s1 + $0x1e0] sm:$0xff]  }
  0x2e   : > { %5424 = vmatpush3.bf16.msra.mxu1 %v5982_v20  ;;  %5393 = vmatprep.subr.bf16.mxu0 %v5983_v22  ;;  %v6045_v20 = vld [vmem:[%s6286_s28 + $0xf8] sm:$0xff]  }
  0x2f   : > { %5425 = vmatprep.subr.bf16.mxu1 %v5984_v23  ;;  %5347 = vmatprep.mubr.bf16.mxu0 %v5985_v24  ;;  %v6049_v24 = vld [vmem:[%s7481_s1 + $0x190] sm:$0xff]  }
  0x30   : > { %5379 = vmatprep.mubr.bf16.mxu1 %v6329_v25 }
  0x31   : > { %5394 = vmatpush3.bf16.msra.mxu0 %v5983_v22  ;;  %v6048_v22 = vld [vmem:[%s7481_s1 + $0x1d8] sm:$0xff]  }
  0x32   : > { %5426 = vmatpush3.bf16.msra.mxu1 %v5984_v23  ;;  %5395 = vmatprep.subr.bf16.mxu0 %v5989_v27  ;;  %v6046_v23 = vld [vmem:[%s6286_s28 + $0x100] sm:$0xff]  }
  0x33   : > { %5427 = vmatprep.subr.bf16.mxu1 %v5990_v28 }
  0x34   : > { %5348 = vmatmul.mubr.bf16.gmra.mxu0 %v5987_v26  ;;  %v6051_v26 = vld [vmem:[%s6286_s28 + $0x108] sm:$0xff]  }
  0x35   : > { %5380 = vmatmul.mubr.bf16.gmra.mxu1 %v6341_v29  ;;  %5396 = vmatpush3.bf16.msra.mxu0 %v5989_v27  ;;  %v6052_v27 = vld [vmem:[%s6286_s28 + $0x110] sm:$0xff]  }
  0x36   : > { %5428 = vmatpush3.bf16.msra.mxu1 %v5990_v28  ;;  %5397 = vmatprep.subr.bf16.mxu0 %v5991_v30  ;;  %v6053_v28 = vld [vmem:[%s7481_s1 + $0x188] sm:$0xff]  }
  0x37   : > { %5429 = vmatprep.subr.bf16.mxu1 %v5992_v31  ;;  %5351 = vmatprep.mubr.bf16.mxu0 %v5993_v32  ;;  %v6546_v32 = vld [vmem:[%s6286_s28 + $0x8] sm:$0xff]  }
  0x38   : > { %5383 = vmatprep.mubr.bf16.mxu1 %v6351_v33 }
  0x39   : > { %5398 = vmatpush3.bf16.msra.mxu0 %v5991_v30  ;;  %v6055_v30 = vld [vmem:[%s7481_s1 + $0x180] sm:$0xff]  }
  0x3a   : > { %5430 = vmatpush3.bf16.msra.mxu1 %v5992_v31  ;;  %5399 = vmatprep.subr.bf16.mxu0 %v5997_v35  ;;  %v6056_v31 = vld [vmem:[%s7481_s1 + $0x1c0] sm:$0xff]  }
  0x3b   : > { %5431 = vmatprep.subr.bf16.mxu1 %v5998_v36 }
  0x3c   : > { %5352 = vmatmul.mubr.bf16.gmra.mxu0 %v5995_v34  ;;  %v6059_v34 = vld [vmem:[%s7481_s1 + $0x238] sm:$0xff]  }
  0x3d   : > { %5384 = vmatmul.mubr.bf16.gmra.mxu1 %v6363_v37  ;;  %5400 = vmatpush3.bf16.msra.mxu0 %v5997_v35  ;;  %v6058_v35 = vld [vmem:[%s6286_s28 + $0x10] sm:$0xff]  }
  0x3e   : > { %5432 = vmatpush3.bf16.msra.mxu1 %v5998_v36  ;;  %5401 = vmatprep.subr.bf16.mxu0 %v5999_v38  ;;  %v6061_v36 = vld [vmem:[%s6286_s28 + $0x58] sm:$0xff]  }
  0x3f   : > { %5433 = vmatprep.subr.bf16.mxu1 %v6000_v39  ;;  %5355 = vmatprep.mubr.bf16.mxu0 %v6001_v40  ;;  %v6065_v40 = vld [vmem:[%s7481_s1 + $0x228] sm:$0xff]  }
  0x40   : > { %5387 = vmatprep.mubr.bf16.mxu1 %v6373_v41 }
  0x41   : > { %5402 = vmatpush3.bf16.msra.mxu0 %v5999_v38  ;;  %v6063_v38 = vld [vmem:[%s6286_s28 + $0x18] sm:$0xff]  }
  0x42   : > { %5434 = vmatpush3.bf16.msra.mxu1 %v6000_v39  ;;  %5403 = vmatprep.subr.bf16.mxu0 %v6005_v42  ;;  %v6066_v39 = vld [vmem:[%s6286_s28 + $0x60] sm:$0xff]  }
  0x43   : > { %5435 = vmatprep.subr.bf16.mxu1 %v6006_v43 }
  0x44   : > { %5356 = vmatmul.mubr.bf16.gmra.mxu0 %v6003_v44  ;;  %v6069_v44 = vld [vmem:[%s6286_s28 + $0x28] sm:$0xff]  }
  0x45   : > { %5388 = vmatmul.mubr.bf16.gmra.mxu1 %v6385_v45  ;;  %5404 = vmatpush3.bf16.msra.mxu0 %v6005_v42  ;;  %v6067_v42 = vld [vmem:[%s6286_s28 + $0x68] sm:$0xff]  }
  0x46   : > { %5436 = vmatpush3.bf16.msra.mxu1 %v6006_v43  ;;  %5405 = vmatprep.subr.bf16.mxu0 %v6007_v46  ;;  %v6068_v43 = vld [vmem:[%s7481_s1 + $0x220] sm:$0xff]  }
  0x47   : > { %5437 = vmatprep.subr.bf16.mxu1 %v6008_v47  ;;  %5407 = vmatprep.mubr.bf16.mxu0 %v6296_v13  ;;  %v6038_v13 = vld [vmem:[%s7481_s1 + $0x1f0] sm:$0xff]  }
  0x48   : > { %5439 = vmatprep.mubr.bf16.mxu1 %v6394_v48 }
  0x49   : > { %5406 = vmatpush3.bf16.msra.mxu0 %v6007_v46  ;;  %v6071_v46 = vld [vmem:[%s7481_s1 + $0x218] sm:$0xff]  }
  0x4a   : > { %5438 = vmatpush3.bf16.msra.mxu1 %v6008_v47  ;;  %5455 = vmatprep.subr.bf16.mxu0 %v6011_v49  ;;  %v6070_v47 = vld [vmem:[%s6286_s28 + $0x30] sm:$0xff]  }
  0x4b   : > { %5487 = vmatprep.subr.bf16.mxu1 %v6012_v50 }
  0x4c   : > { %5408 = vmatmul.mubr.bf16.vlgmr.msra.gmra.mxu0 %v6319_v21  ;;  %v6047_v21 = vld [vmem:[%s7481_s1 + $0x198] sm:$0xff]  }
  0x4d   : > { %5440 = vmatmul.mubr.bf16.vlgmr.msra.gmra.mxu1 %v6406_v51  ;;  %5456 = vmatpush3.bf16.msra.mxu0 %v6011_v49  ;;  %v6074_v49 = vld [vmem:[%s7481_s1 + $0x210] sm:$0xff]  }
  0x4e   : > { %5488 = vmatpush3.bf16.msra.mxu1 %v6012_v50  ;;  %5457 = vmatprep.subr.bf16.mxu0 %v6013_v52  ;;  %v6075_v50 = vld [vmem:[%s6286_s28 + $0x38] sm:$0xff]  }
  0x4f   : > { %5489 = vmatprep.subr.bf16.mxu1 %v6014_v53  ;;  %5411 = vmatprep.mubr.bf16.mxu0 %v6329_v25  ;;  %v6050_v25 = vld [vmem:[%s7481_s1 + $0x1d0] sm:$0xff]  }
  0x50   : > { %5443 = vmatprep.mubr.bf16.mxu1 %v6416_v54 }
  0x51   : > { %5458 = vmatpush3.bf16.msra.mxu0 %v6013_v52  ;;  %v6077_v52 = vld [vmem:[%s7481_s1 + $0x208] sm:$0xff]  }
  0x52   : > { %5490 = vmatpush3.bf16.msra.mxu1 %v6014_v53  ;;  %5459 = vmatprep.subr.bf16.mxu0 %v6017_v55  ;;  %v6076_v53 = vld [vmem:[%s6286_s28 + $0x40] sm:$0xff]  }
  0x53   : > { %5491 = vmatprep.subr.bf16.mxu1 %v6018_v56 }
  0x54   : > { %5412 = vmatmul.mubr.bf16.gmra.mxu0 %v6341_v29  ;;  %v6054_v29 = vld [vmem:[%s7481_s1 + $0x1c8] sm:$0xff]  }
  0x55   : > { %5444 = vmatmul.mubr.bf16.gmra.mxu1 %v6428_v57  ;;  %5460 = vmatpush3.bf16.msra.mxu0 %v6017_v55  ;;  %v6080_v55 = vld [vmem:[%s7481_s1 + $0x200] sm:$0xff]  }
  0x56   : > { %5492 = vmatpush3.bf16.msra.mxu1 %v6018_v56  ;;  %5461 = vmatprep.subr.bf16.mxu0 %v6019_v58  ;;  %v6081_v56 = vld [vmem:[%s7485_s5 + $0x38] sm:$0xff]  }
  0x57   : > { %5493 = vmatprep.subr.bf16.mxu1 %v6020_v59  ;;  %5415 = vmatprep.mubr.bf16.mxu0 %v6351_v33  ;;  %v6060_v33 = vld [vmem:[%s6286_s28 + $0x50] sm:$0xff]  }
  0x58   : > { %5447 = vmatprep.mubr.bf16.mxu1 %v6438_v60 }
  0x59   : > { %5462 = vmatpush3.bf16.msra.mxu0 %v6019_v58  ;;  %v6083_v58 = vld [vmem:[%s7485_s5 + $0x28] sm:$0xff]  }
  0x5a   : > { %5494 = vmatpush3.bf16.msra.mxu1 %v6020_v59  ;;  %5463 = vmatprep.subr.bf16.mxu0 %v6023_v61  ;;  %v6084_v59 = vld [vmem:[%s7485_s5 + $0x20] sm:$0xff]  }
  0x5b   : > { %5495 = vmatprep.subr.bf16.mxu1 %v6024_v62 }
  0x5c   : > { %5416 = vmatmul.mubr.bf16.gmra.mxu0 %v6363_v37  ;;  %v6062_v37 = vld [vmem:[%s7481_s1 + $0x230] sm:$0xff]  }
  0x5d   : > { %5448 = vmatmul.mubr.bf16.gmra.mxu1 %v6450_v63  ;;  %5464 = vmatpush3.bf16.msra.mxu0 %v6023_v61  ;;  %v6086_v61 = vld [vmem:[%s7485_s5 + $0x10] sm:$0xff]  }
  0x5e   : > { %5496 = vmatpush3.bf16.msra.mxu1 %v6024_v62  ;;  %5465 = vmatprep.subr.bf16.mxu0 %v6025_v0  ;;  %v6087_v62 = vld [vmem:[%s7485_s5 + $0x8] sm:$0xff]  }
  0x5f   : > { %5497 = vmatprep.subr.bf16.mxu1 %v6026_v1  ;;  %5419 = vmatprep.mubr.bf16.mxu0 %v6373_v41  ;;  %v6064_v41 = vld [vmem:[%s6286_s28 + $0x20] sm:$0xff]  }
  0x60   : > { %5451 = vmatprep.mubr.bf16.mxu1 %v6460_v2 }
  0x61   : > { %5466 = vmatpush3.bf16.msra.mxu0 %v6025_v0  ;;  %v6089_v0 = vld [vmem:[%s6286_s28 + $0xd8] sm:$0xff]  }
  0x62   : > { %5498 = vmatpush3.bf16.msra.mxu1 %v6026_v1  ;;  %5467 = vmatprep.subr.bf16.mxu0 %v6029_v3  ;;  %v6090_v1 = vld [vmem:[%s6286_s28 + $0xe0] sm:$0xff]  }
  0x63   : > { %5499 = vmatprep.subr.bf16.mxu1 %v6030_v4 }
  0x64   : > { %5420 = vmatmul.mubr.bf16.gmra.mxu0 %v6385_v45  ;;  %v6072_v45 = vld [vmem:[%s6286_s28 + $0x70] sm:$0xff]  }
  0x65   : > { %5452 = vmatmul.mubr.bf16.gmra.mxu1 %v6472_v5  ;;  %5468 = vmatpush3.bf16.msra.mxu0 %v6029_v3  ;;  %v6092_v3 = vld [vmem:[%s7483_s3 + $0x78] sm:$0xff]  }
  0x66   : > { %5500 = vmatpush3.bf16.msra.mxu1 %v6030_v4  ;;  %5469 = vmatprep.subr.bf16.mxu0 %v6031_v6  ;;  %v6093_v4 = vld [vmem:[%s6286_s28 + $0xe8] sm:$0xff]  }
  0x67   : > { %5501 = vmatprep.subr.bf16.mxu1 %v6032_v7  ;;  %5471 = vmatprep.mubr.bf16.mxu0 %v6033_v8 }
  0x68   : > { %5503 = vmatprep.mubr.bf16.mxu1 %v6394_v48  ;;  %v6073_v48 = vld [vmem:[%s6286_s28 + $0x78] sm:$0xff]  }
  0x69   : > { %5470 = vmatpush3.bf16.msra.mxu0 %v6031_v6  ;;  %v6095_v6 = vld [vmem:[%s7483_s3 + $0x30] sm:$0xff]  }
  0x6a   : > { %5502 = vmatpush3.bf16.msra.mxu1 %v6032_v7  ;;  %5519 = vmatprep.subr.bf16.mxu0 %v6035_v9  ;;  %v6096_v7 = vld [vmem:[%s7483_s3 + $0x70] sm:$0xff]  }
  0x6b   : > { %5551 = vmatprep.subr.bf16.mxu1 %v6036_v10 }
  0x6c   : > { %5472 = vmatmul.mubr.bf16.vlgmr.msra.gmra.mxu0 %v6034_v11 }
  0x6d   : > { %5504 = vmatmul.mubr.bf16.vlgmr.msra.gmra.mxu1 %v6406_v51  ;;  %5520 = vmatpush3.bf16.msra.mxu0 %v6035_v9  ;;  %v6078_v51 = vld [vmem:[%s6286_s28 + $0x80] sm:$0xff]  }
  0x6e   : > { %5552 = vmatpush3.bf16.msra.mxu1 %v6036_v10  ;;  %5521 = vmatprep.subr.bf16.mxu0 %v6037_v12 }
  0x6f   : > { %5553 = vmatprep.subr.bf16.mxu1 %v6038_v13  ;;  %5475 = vmatprep.mubr.bf16.mxu0 %v6039_v14 }
  0x70   : > { %5507 = vmatprep.mubr.bf16.mxu1 %v6416_v54  ;;  %v6079_v54 = vld [vmem:[%s6286_s28 + $0x88] sm:$0xff]  }
  0x71   : > { %5522 = vmatpush3.bf16.msra.mxu0 %v6037_v12  ;;  %v6097_v12 = vld [vmem:[%s7483_s3 + $0x28] sm:$0xff]  }
  0x72   : > { %5554 = vmatpush3.bf16.msra.mxu1 %v6038_v13  ;;  %5523 = vmatprep.subr.bf16.mxu0 %v6041_v15  ;;  %v6098_v13 = vld [vmem:[%s7483_s3 + $0x68] sm:$0xff]  }
  0x73   : > { %5555 = vmatprep.subr.bf16.mxu1 %v6042_v16 }
  0x74   : > { %5476 = vmatmul.mubr.bf16.gmra.mxu0 %v6040_v17 }
  0x75   : > { %5508 = vmatmul.mubr.bf16.gmra.mxu1 %v6428_v57  ;;  %5524 = vmatpush3.bf16.msra.mxu0 %v6041_v15  ;;  %v6082_v57 = vld [vmem:[%s7485_s5 + $0x30] sm:$0xff]   ;;  %v6099_v15 = vld [vmem:[%s6286_s28 + $0xf8] sm:$0xff]  }
  0x76   : > { %5556 = vmatpush3.bf16.msra.mxu1 %v6042_v16  ;;  %5525 = vmatprep.subr.bf16.mxu0 %v6043_v18 }
  0x77   : > { %5557 = vmatprep.subr.bf16.mxu1 %v6044_v19  ;;  %5479 = vmatprep.mubr.bf16.mxu0 %v6045_v20 }
  0x78   : > { %5511 = vmatprep.mubr.bf16.mxu1 %v6438_v60  ;;  %v6085_v60 = vld [vmem:[%s7485_s5 + $0x18] sm:$0xff]  }
  0x79   : > { %5526 = vmatpush3.bf16.msra.mxu0 %v6043_v18  ;;  %v6100_v18 = vld [vmem:[%s6286_s28 + $0x100] sm:$0xff]  }
  0x7a   : > { %5558 = vmatpush3.bf16.msra.mxu1 %v6044_v19  ;;  %5527 = vmatprep.subr.bf16.mxu0 %v6047_v21 }
  0x7b   : > { %5559 = vmatprep.subr.bf16.mxu1 %v6048_v22 }
  0x7c   : > { %5480 = vmatmul.mubr.bf16.gmra.mxu0 %v6046_v23 }
  0x7d   : > { %5512 = vmatmul.mubr.bf16.gmra.mxu1 %v6450_v63  ;;  %5528 = vmatpush3.bf16.msra.mxu0 %v6047_v21  ;;  %v6088_v63 = vld [vmem:[%s7485_s5] sm:$0xff]  }
  0x7e   : > { %5560 = vmatpush3.bf16.msra.mxu1 %v6048_v22  ;;  %5529 = vmatprep.subr.bf16.mxu0 %v6049_v24  ;;  %v6101_v21 = vld [vmem:[%s7483_s3 + $0x20] sm:$0xff]  }
  0x7f   : > { %5561 = vmatprep.subr.bf16.mxu1 %v6050_v25  ;;  %5483 = vmatprep.mubr.bf16.mxu0 %v6051_v26  ;;  %v6102_v22 = vld [vmem:[%s7483_s3 + $0x60] sm:$0xff]  }
  0x80   : > { %5515 = vmatprep.mubr.bf16.mxu1 %v6460_v2  ;;  %v6091_v2 = vld [vmem:[%s7483_s3 + $0x38] sm:$0xff]  }
  0x81   : > { %5530 = vmatpush3.bf16.msra.mxu0 %v6049_v24 }
  0x82   : > { %5562 = vmatpush3.bf16.msra.mxu1 %v6050_v25  ;;  %5531 = vmatprep.subr.bf16.mxu0 %v6053_v28 }
  0x83   : > { %5563 = vmatprep.subr.bf16.mxu1 %v6054_v29 }
  0x84   : > { %5484 = vmatmul.mubr.bf16.gmra.mxu0 %v6052_v27 }
  0x85   : > { %5516 = vmatmul.mubr.bf16.gmra.mxu1 %v6472_v5  ;;  %5532 = vmatpush3.bf16.msra.mxu0 %v6053_v28  ;;  %v6094_v5 = vld [vmem:[%s6286_s28 + $0xf0] sm:$0xff]   ;;  %v6103_v28 = vld [vmem:[%s7483_s3 + $0x18] sm:$0xff]  }
  0x86   : > { %5564 = vmatpush3.bf16.msra.mxu1 %v6054_v29  ;;  %5533 = vmatprep.subr.bf16.mxu0 %v6055_v30  ;;  %v6104_v29 = vld [vmem:[%s7483_s3 + $0x58] sm:$0xff]  }
  0x87   : > { %5565 = vmatprep.subr.bf16.mxu1 %v6056_v31  ;;  %5535 = vmatprep.mubr.bf16.mxu0 %v6546_v32 }
  0x88   : > { %5567 = vmatprep.mubr.bf16.mxu1 %v6060_v33 }
  0x89   : > { %5534 = vmatpush3.bf16.msra.mxu0 %v6055_v30 }
  0x8a   : > { %5566 = vmatpush3.bf16.msra.mxu1 %v6056_v31  ;;  %5583 = vmatprep.subr.bf16.mxu0 %v6059_v34  ;;  %v6105_v31 = vld [vmem:[%s6286_s28 + $0x108] sm:$0xff]  }
  0x8b   : > { %5615 = vmatprep.subr.bf16.mxu1 %v6081_v56 }
  0x8c   : > { %5536 = vmatmul.mubr.bf16.vlgmr.msra.gmra.mxu0 %v6058_v35 }
  0x8d   : > { %5584 = vmatpush3.bf16.msra.mxu0 %v6059_v34  ;;  %5568 = vmatmul.mubr.bf16.vlgmr.msra.gmra.mxu1 %v6061_v36  ;;  %v6106_v34 = vld [vmem:[%s6286_s28 + $0x110] sm:$0xff]   ;;  %s5022_s28 = sshll.u32 %s7489_s25, 6 }
  0x8e   : > { %5585 = vmatprep.subr.bf16.mxu0 %v6062_v37  ;;  %5539 = vmatprep.mubr.bf16.mxu0 %v6063_v38  ;;  %s7445_s11 = scalar_lea.vmem %s7487_s7, %s5022_s28 }
  0x8f   : > { %5571 = vmatprep.mubr.bf16.mxu1 %v6066_v39  ;;  %5616 = vmatpush3.bf16.msra.mxu1 %v6081_v56 }
  0x90   : > { %5617 = vmatprep.subr.bf16.mxu1 %v6082_v57 }
  0x91   : > { %5586 = vmatpush3.bf16.msra.mxu0 %v6062_v37  ;;  %v6107_v37 = vld [vmem:[%s7483_s3 + $0x10] sm:$0xff]  }
  0x92   : > { %5587 = vmatprep.subr.bf16.mxu0 %v6065_v40 }
  0x93   : > { %5618 = vmatpush3.bf16.msra.mxu1 %v6082_v57 }
  0x94   : > { %5540 = vmatmul.mubr.bf16.gmra.mxu0 %v6064_v41  ;;  %5619 = vmatprep.subr.bf16.mxu1 %v6083_v58 }
  0x95   : > { %5588 = vmatpush3.bf16.msra.mxu0 %v6065_v40  ;;  %5572 = vmatmul.mubr.bf16.gmra.mxu1 %v6067_v42  ;;  %v6201_v42 = vmov 0  }
  0x96   : > { %5589 = vmatprep.subr.bf16.mxu0 %v6068_v43  ;;  %5543 = vmatprep.mubr.bf16.mxu0 %v6069_v44  ;;  %280 = vst [vmem:[#allocation2] sm:$0xf] %v6201_v42  ;;  %281 = vst [vmem:[#allocation2 + $0x4] sm:$0xf] %v6201_v42 }
  0x97   : > { %5575 = vmatprep.mubr.bf16.mxu1 %v6072_v45  ;;  %5620 = vmatpush3.bf16.msra.mxu1 %v6083_v58  ;;  %283 = vst [vmem:[#allocation2 + $0x48] sm:$0xf] %v6201_v42  ;;  %284 = vst [vmem:[#allocation2 + $0x4c] sm:$0xf] %v6201_v42  ;;  %v6109_v45 = vld [vmem:[%s7483_s3 + $0x8] sm:$0xff]  }
  0x98   : > { %5621 = vmatprep.subr.bf16.mxu1 %v6084_v59  ;;  %286 = vst [vmem:[#allocation2 + $0xc] sm:$0xf] %v6201_v42  ;;  %287 = vst [vmem:[#allocation2 + $0x14] sm:$0xf] %v6201_v42 }
  0x99   : > { %5590 = vmatpush3.bf16.msra.mxu0 %v6068_v43  ;;  %288 = vst [vmem:[#allocation2 + $0x1c] sm:$0xf] %v6201_v42  ;;  %289 = vst [vmem:[#allocation2 + $0x24] sm:$0xf] %v6201_v42 }
  0x9a   : > { %5591 = vmatprep.subr.bf16.mxu0 %v6071_v46  ;;  %290 = vst [vmem:[#allocation2 + $0x2c] sm:$0xf] %v6201_v42  ;;  %291 = vst [vmem:[#allocation2 + $0x34] sm:$0xf] %v6201_v42 }
  0x9b   : > { %5622 = vmatpush3.bf16.msra.mxu1 %v6084_v59  ;;  %292 = vst [vmem:[#allocation2 + $0x3c] sm:$0xf] %v6201_v42  ;;  %293 = vst [vmem:[#allocation2 + $0x44] sm:$0xf] %v6201_v42 }
  0x9c   : > { %5544 = vmatmul.mubr.bf16.gmra.mxu0 %v6070_v47  ;;  %5623 = vmatprep.subr.bf16.mxu1 %v6085_v60  ;;  %285 = vst [vmem:[#allocation2 + $0x4] sm:$0xf] %v6201_v42  ;;  %294 = vst [vmem:[#allocation2 + $0x4c] sm:$0xf] %v6201_v42 }
  0x9d   : > { %5592 = vmatpush3.bf16.msra.mxu0 %v6071_v46  ;;  %5576 = vmatmul.mubr.bf16.gmra.mxu1 %v6073_v48  ;;  %v6110_v46 = vld [vmem:[%s7483_s3 + $0x48] sm:$0xff]  }
  0x9e   : > { %5593 = vmatprep.subr.bf16.mxu0 %v6074_v49  ;;  %5547 = vmatprep.mubr.bf16.mxu0 %v6075_v50 }
  0x9f   : > { %5579 = vmatprep.mubr.bf16.mxu1 %v6078_v51  ;;  %5624 = vmatpush3.bf16.msra.mxu1 %v6085_v60  ;;  %v909_v60 = vlaneseq }
  0xa0   : > { %5625 = vmatprep.subr.bf16.mxu1 %v6086_v61 }
  0xa1   : > { %5594 = vmatpush3.bf16.msra.mxu0 %v6074_v49 }
  0xa2   : > { %5595 = vmatprep.subr.bf16.mxu0 %v6077_v52 }
  0xa3   : > { %5626 = vmatpush3.bf16.msra.mxu1 %v6086_v61  ;;  %v6682_v57 = vld [vmem:[#allocation2] sm:$0xff]   ;;  %v6689_v61 = vld [vmem:[%s7483_s3 + $0xb8] sm:$0xff]  }
  0xa4   : > { %5548 = vmatmul.mubr.bf16.gmra.mxu0 %v6076_v53  ;;  %5627 = vmatprep.subr.bf16.mxu1 %v6087_v62 }
  0xa5   : > { %5596 = vmatpush3.bf16.msra.mxu0 %v6077_v52  ;;  %5580 = vmatmul.mubr.bf16.gmra.mxu1 %v6079_v54  ;;  %v6111_v52 = vld [vmem:[%s7483_s3] sm:$0xff]  }
  0xa6   : > { %5597 = vmatprep.subr.bf16.mxu0 %v6080_v55  ;;  %5599 = vmatprep.mubr.bf16.mxu0 %v6546_v32 }
  0xa7   : > { %5628 = vmatpush3.bf16.msra.mxu1 %v6087_v62  ;;  %5631 = vmatprep.mubr.bf16.mxu1 %v6089_v0  ;;  %v6694_v62 = vld [vmem:[%s7483_s3 + $0xf8] sm:$0xff]  }
  0xa8   : > { %5629 = vmatprep.subr.bf16.mxu1 %v6088_v63 }
  0xa9   : > { %5598 = vmatpush3.bf16.msra.mxu0 %v6080_v55 }
  0xaa   : > { %5647 = vmatprep.subr.bf16.mxu0 %v6091_v2 }
  0xab   : > { %5630 = vmatpush3.bf16.msra.mxu1 %v6088_v63 }
  0xac   : > { %5600 = vmatmul.mubr.bf16.vlgmr.msra.gmra.mxu0 %v6058_v35  ;;  %5679 = vmatprep.subr.bf16.mxu1 %v6092_v3 }
  0xad   : > { %5603 = vmatprep.mubr.bf16.mxu0 %v6063_v38  ;;  %5648 = vmatpush3.bf16.msra.mxu0 %v6091_v2  ;;  %v6108_v38 = vld [vmem:[%s7483_s3 + $0x50] sm:$0xff]  }
  0xae   : > { %5632 = vmatmul.mubr.bf16.vlgmr.msra.gmra.mxu1 %v6090_v1  ;;  %5649 = vmatprep.subr.bf16.mxu0 %v6095_v6 }
  0xaf   : > { %5680 = vmatpush3.bf16.msra.mxu1 %v6092_v3  ;;  %5635 = vmatprep.mubr.bf16.mxu1 %v6093_v4  ;;  %v6702_v4 = vshrl.u32 %v909_v60, 7 }
  0xb0   : > { %5681 = vmatprep.subr.bf16.mxu1 %v6096_v7 }
  0xb1   : > { %5650 = vmatpush3.bf16.msra.mxu0 %v6095_v6  ;;  %vm911_vm0 = vcmp.lt.s32.totalorder %v6702_v4, 7  ;;  %vm2729_vm1 = vcmp.lt.s32.totalorder %v6702_v4, 1 }
  0xb2   : > { %5651 = vmatprep.subr.bf16.mxu0 %v6097_v12 }
  0xb3   : > { %5682 = vmatpush3.bf16.msra.mxu1 %v6096_v7 }
  0xb4   : > { %5604 = vmatmul.mubr.bf16.gmra.mxu0 %v6064_v41  ;;  %5683 = vmatprep.subr.bf16.mxu1 %v6098_v13 }
  0xb5   : > { %5607 = vmatprep.mubr.bf16.mxu0 %v6069_v44  ;;  %5652 = vmatpush3.bf16.msra.mxu0 %v6097_v12 }
  0xb6   : > { %5636 = vmatmul.mubr.bf16.gmra.mxu1 %v6094_v5  ;;  %5653 = vmatprep.subr.bf16.mxu0 %v6101_v21 }
  0xb7   : > { %5684 = vmatpush3.bf16.msra.mxu1 %v6098_v13  ;;  %5639 = vmatprep.mubr.bf16.mxu1 %v6099_v15 }
  0xb8   : > { %5685 = vmatprep.subr.bf16.mxu1 %v6102_v22 }
  0xb9   : > { %5654 = vmatpush3.bf16.msra.mxu0 %v6101_v21 }
  0xba   : > { %5655 = vmatprep.subr.bf16.mxu0 %v6103_v28 }
  0xbb   : > { %5686 = vmatpush3.bf16.msra.mxu1 %v6102_v22 }
  0xbc   : > { %5608 = vmatmul.mubr.bf16.gmra.mxu0 %v6070_v47  ;;  %5687 = vmatprep.subr.bf16.mxu1 %v6104_v29 }
  0xbd   : > { %5611 = vmatprep.mubr.bf16.mxu0 %v6075_v50  ;;  %5656 = vmatpush3.bf16.msra.mxu0 %v6103_v28 }
  0xbe   : > { %5640 = vmatmul.mubr.bf16.gmra.mxu1 %v6100_v18  ;;  %5657 = vmatprep.subr.bf16.mxu0 %v6107_v37 }
  0xbf   : > { %5688 = vmatpush3.bf16.msra.mxu1 %v6104_v29  ;;  %5643 = vmatprep.mubr.bf16.mxu1 %v6105_v31 }
  0xc0   : > { %5689 = vmatprep.subr.bf16.mxu1 %v6108_v38 }
  0xc1   : > { %5658 = vmatpush3.bf16.msra.mxu0 %v6107_v37 }
  0xc2   : > { %5659 = vmatprep.subr.bf16.mxu0 %v6109_v45 }
  0xc3   : > { %5690 = vmatpush3.bf16.msra.mxu1 %v6108_v38 }
  0xc4   : > { %5612 = vmatmul.mubr.bf16.gmra.mxu0 %v6076_v53  ;;  %5691 = vmatprep.subr.bf16.mxu1 %v6110_v46  ;;  %v6112_v53 = vld [vmem:[%s7483_s3 + $0x40] sm:$0xff]  }
  0xc5   : > { %5660 = vmatpush3.bf16.msra.mxu0 %v6109_v45  ;;  %5663 = vmatprep.mubr.bf16.mxu0 %v6682_v57 }
  0xc6   : > { %5644 = vmatmul.mubr.bf16.gmra.mxu1 %v6106_v34  ;;  %5661 = vmatprep.subr.bf16.mxu0 %v6111_v52 }
  0xc7   : > { %5692 = vmatpush3.bf16.msra.mxu1 %v6110_v46  ;;  %5695 = vmatprep.mubr.bf16.mxu1 %v6682_v57 }
  0xc8   : > { %5693 = vmatprep.subr.bf16.mxu1 %v6112_v53 }
  0xc9   : > { %5662 = vmatpush3.bf16.msra.mxu0 %v6111_v52 }
  0xca   : > { %5711 = vmatprep.subr.bf16.mxu0 %v6689_v61 }
  0xcb   : > { %5694 = vmatpush3.bf16.msra.mxu1 %v6112_v53 }
  0xcc   : > { %5743 = vmatprep.subr.bf16.mxu1 %v6694_v62 }
  0xec   : > { %v5345_v8 = vpop.f32.mrf.mxu0 }
  0xed   : > { %v5377_v9 = vpop.f32.mrf.mxu1 }
  0xee   : > { %v6630_v10 = vadd.f32 %v5377_v9, %v5345_v8  ;;  %v491_v11 = vpop.f32.mrf.mxu0 }
  0xef   : > { %v676_v14 = vpop.f32.mrf.mxu1 }
  0xf0   : > { %v6639_v16 = vadd.f32 %v676_v14, %v491_v11  ;;  %v5346_v17 = vpop.f32.mrf.mxu0 }
  0xf1   : > { %v5378_v19 = vpop.f32.mrf.mxu1 }
  0xf2   : > { %v494_v20 = vpop.f32.mrf.mxu0 }
  0xf3   : > { %v679_v23 = vpop.f32.mrf.mxu1 }
  0xf4   : > { %v5349_v24 = vpop.f32.mrf.mxu0 }
  0xf5   : > { %v5381_v25 = vpop.f32.mrf.mxu1 }
  0xf6   : > { %v6648_v26 = vadd.f32 %v5381_v25, %v5349_v24  ;;  %v505_v27 = vpop.f32.mrf.mxu0 }
  0xf7   : > { %v690_v30 = vpop.f32.mrf.mxu1 }
  0xf8   : > { %v6657_v32 = vadd.f32 %v690_v30, %v505_v27  ;;  %v5350_v33 = vpop.f32.mrf.mxu0 }
  0xf9   : > { %v5382_v35 = vpop.f32.mrf.mxu1 }
  0xfa   : > { %v508_v36 = vpop.f32.mrf.mxu0 }
  0xfb   : > { %v693_v39 = vpop.f32.mrf.mxu1 }
  0xfc   : > { %v5353_v40 = vpop.f32.mrf.mxu0 }
  0xfd   : > { %v5385_v41 = vpop.f32.mrf.mxu1 }
  0xfe   : > { %v6666_v43 = vadd.f32 %v5385_v41, %v5353_v40  ;;  %v519_v44 = vpop.f32.mrf.mxu0 }
  0xff   : > { %v704_v47 = vpop.f32.mrf.mxu1 }
 0x100   : > { %v6674_v48 = vadd.f32 %v704_v47, %v519_v44  ;;  %v5354_v49 = vpop.f32.mrf.mxu0 }
 0x101   : > { %v5386_v50 = vpop.f32.mrf.mxu1 }
 0x102   : > { %v522_v51 = vpop.f32.mrf.mxu0 }
 0x103   : > { %v707_v54 = vpop.f32.mrf.mxu1 }
 0x104   : > { %v5357_v55 = vpop.f32.mrf.mxu0 }
 0x105   : > { %v5389_v56 = vpop.f32.mrf.mxu1 }
 0x106   : > { %v6684_v58 = vadd.f32 %v5389_v56, %v5357_v55  ;;  %v533_v59 = vpop.f32.mrf.mxu0 }
 0x107   : > { %v718_v63 = vpop.f32.mrf.mxu1 }
 0x108   : > { %v6698_v0 = vadd.f32 %v718_v63, %v533_v59  ;;  %v5358_v1 = vpop.f32.mrf.mxu0 }
 0x109   : > { %v5390_v2 = vpop.f32.mrf.mxu1 }
 0x10a   : > { %v536_v3 = vpop.f32.mrf.mxu0 }
 0x10b   : > { %v721_v5 = vpop.f32.mrf.mxu1 }
 0x10c   : > { %v5409_v6 = vpop.f32.mrf.mxu0 }
 0x10d   : > { %v5441_v7 = vpop.f32.mrf.mxu1  ;;  %v895_v12 = vrot.slane %v5409_v6, 1 }
 0x10e   : > { %v830_v8 = vpop.f32.mrf.mxu0 }
 0x10f   : > { %v1109_v9 = vpop.f32.mrf.mxu1  ;;  %v893_v17 = vrot.slane %v830_v8, 1 }
 0x110   : > { %v5410_v11 = vpop.f32.mrf.mxu0 }
 0x111   : > { %v896_v13 = vrot.slane %v5410_v11, 1  ;;  %v5442_v14 = vpop.f32.mrf.mxu1 }
 0x112   : > { %v833_v15 = vpop.f32.mrf.mxu0 }
 0x113   : > { %v918_v18 = vsel %vm911_vm0, %v895_v12, %v896_v13  ;;  %v894_v19 = vrot.slane %v833_v15, 1  ;;  %v1112_v20 = vpop.f32.mrf.mxu1 }
 0x114   : > { %v5413_v21 = vpop.f32.mrf.mxu0  ;;  %v921_v22 = vadd.f32 %v918_v18, %v6630_v10 }
 0x115   : > { %v5445_v23 = vpop.f32.mrf.mxu1  ;;  %v919_v24 = vsel %vm911_vm0, %v893_v17, %v894_v19  ;;  %v899_v33 = vrot.slane %v5413_v21, 1 }
 0x116   : > { %v846_v25 = vpop.f32.mrf.mxu0  ;;  %v6710_v27 = vadd.f32 %v5441_v7, %v921_v22  ;;  %v920_v28 = vadd.f32 %v919_v24, %v6639_v16 }
 0x117   : > { %v1123_v29 = vpop.f32.mrf.mxu1  ;;  %v897_v37 = vrot.slane %v846_v25, 1 }
 0x118   : > { %v5414_v30 = vpop.f32.mrf.mxu0  ;;  %v6713_v31 = vadd.f32 %v1109_v9, %v920_v28 }
 0x119   : > { %v900_v34 = vrot.slane %v5414_v30, 1  ;;  %v5446_v35 = vpop.f32.mrf.mxu1 }
 0x11a   : > { %v849_v36 = vpop.f32.mrf.mxu0 }
 0x11b   : > { %v916_v10 = vsel %vm911_vm0, %v899_v33, %v900_v34  ;;  %v898_v38 = vrot.slane %v849_v36, 1  ;;  %v1126_v39 = vpop.f32.mrf.mxu1 }
 0x11c   : > { %v5417_v40 = vpop.f32.mrf.mxu0  ;;  %v923_v41 = vadd.f32 %v916_v10, %v6648_v26 }
 0x11d   : > { %v5449_v42 = vpop.f32.mrf.mxu1  ;;  %v917_v16 = vsel %vm911_vm0, %v897_v37, %v898_v38  ;;  %v903_v51 = vrot.slane %v5417_v40, 1 }
 0x11e   : > { %v862_v44 = vpop.f32.mrf.mxu0  ;;  %v6720_v45 = vadd.f32 %v5445_v23, %v923_v41  ;;  %v922_v46 = vadd.f32 %v917_v16, %v6657_v32 }
 0x11f   : > { %v1137_v47 = vpop.f32.mrf.mxu1  ;;  %v901_v55 = vrot.slane %v862_v44, 1 }
 0x120   : > { %v5418_v49 = vpop.f32.mrf.mxu0  ;;  %v6723_v50 = vadd.f32 %v1123_v29, %v922_v46 }
 0x121   : > { %v904_v52 = vrot.slane %v5418_v49, 1  ;;  %v5450_v53 = vpop.f32.mrf.mxu1 }
 0x122   : > { %v865_v54 = vpop.f32.mrf.mxu0 }
 0x123   : > { %v914_v26 = vsel %vm911_vm0, %v903_v51, %v904_v52  ;;  %v902_v56 = vrot.slane %v865_v54, 1  ;;  %v1140_v59 = vpop.f32.mrf.mxu1 }
 0x124   : > { %v5421_v60 = vpop.f32.mrf.mxu0  ;;  %v925_v63 = vadd.f32 %v914_v26, %v6666_v43 }
 0x125   : > { %v5453_v1 = vpop.f32.mrf.mxu1  ;;  %v915_v32 = vsel %vm911_vm0, %v901_v55, %v902_v56  ;;  %v907_v9 = vrot.slane %v5421_v60, 1 }
 0x126   : > { %v878_v2 = vpop.f32.mrf.mxu0  ;;  %v6730_v3 = vadd.f32 %v5449_v42, %v925_v63  ;;  %v924_v5 = vadd.f32 %v915_v32, %v6674_v48 }
 0x127   : > { %v1151_v6 = vpop.f32.mrf.mxu1  ;;  %v905_v14 = vrot.slane %v878_v2, 1 }
 0x128   : > { %v5422_v7 = vpop.f32.mrf.mxu0  ;;  %v6733_v8 = vadd.f32 %v1137_v47, %v924_v5 }
 0x129   : > { %v908_v11 = vrot.slane %v5422_v7, 1  ;;  %v5454_v12 = vpop.f32.mrf.mxu1 }
 0x12a   : > { %v881_v13 = vpop.f32.mrf.mxu0 }
 0x12b   : > { %v912_v43 = vsel %vm911_vm0, %v907_v9, %v908_v11  ;;  %v906_v15 = vrot.slane %v881_v13, 1  ;;  %v1154_v17 = vpop.f32.mrf.mxu1 }
 0x12c   : > { %v6737_v18 = vpop.f32.mrf.mxu0  ;;  %v927_v19 = vadd.f32 %v912_v43, %v6684_v58 }
 0x12d   : > { %v6740_v20 = vpop.f32.mrf.mxu1  ;;  %v913_v48 = vsel %vm911_vm0, %v905_v14, %v906_v15 }
 0x12e   : > { %v6744_v21 = vpop.f32.mrf.mxu0  ;;  %v6746_v22 = vadd.f32 %v5453_v1, %v927_v19  ;;  %v926_v23 = vadd.f32 %v913_v48, %v6698_v0 }
 0x12f   : > { %v6749_v24 = vpop.f32.mrf.mxu1 }
 0x130   : > { %v5474_v25 = vpop.f32.mrf.mxu0  ;;  %v6751_v28 = vadd.f32 %v1151_v6, %v926_v23 }
 0x131   : > { %v5506_v29 = vpop.f32.mrf.mxu1 }
 0x132   : > { %v1322_v30 = vpop.f32.mrf.mxu0 }
 0x133   : > { %v6753_v33 = vpop.f32.mrf.mxu1 }
 0x134   : > { %v6755_v58 = vpop.f32.mrf.mxu0 }
 0x135   : > { %v6757_v34 = vpop.f32.mrf.mxu1 }
 0x136   : > { %v6759_v35 = vpop.f32.mrf.mxu0 }
 0x137   : > { %v6761_v36 = vpop.f32.mrf.mxu1 }
 0x138   : > { %v5478_v37 = vpop.f32.mrf.mxu0 }
 0x139   : > { %v6763_v10 = vpop.f32.mrf.mxu1 }
 0x13a   : > { %v1336_v0 = vpop.f32.mrf.mxu0 }
 0x13b   : > { %v6765_v38 = vpop.f32.mrf.mxu1 }
 0x13c   : > { %v6767_v39 = vpop.f32.mrf.mxu0 }
 0x13d   : > { %v6769_v40 = vpop.f32.mrf.mxu1 }
 0x13e   : > { %v6771_v41 = vpop.f32.mrf.mxu0 }
 0x13f   : > { %v6773_v42 = vpop.f32.mrf.mxu1 }
 0x140   : > { %v5482_v16 = vpop.f32.mrf.mxu0 }
 0x141   : > { %v6775_v44 = vpop.f32.mrf.mxu1 }
 0x142   : > { %v1350_v46 = vpop.f32.mrf.mxu0 }
 0x143   : > { %v6777_v47 = vpop.f32.mrf.mxu1  ;;  %v1546_v46 = vrot.slane %v6740_v20, 1 }
 0x144   : > { %v6779_v49 = vpop.f32.mrf.mxu0 }
 0x145   : > { %v6781_v51 = vpop.f32.mrf.mxu1 }
 0x146   : > { %v6783_v52 = vpop.f32.mrf.mxu0 }
 0x147   : > { %v6785_v53 = vpop.f32.mrf.mxu1 }
 0x148   : > { %v5486_v54 = vpop.f32.mrf.mxu0 }
 0x149   : > { %v6787_v55 = vpop.f32.mrf.mxu1  ;;  %v1547_v54 = vrot.slane %v5506_v29, 1 }
 0x14a   : > { %v1364_v26 = vpop.f32.mrf.mxu0 }
 0x14b   : > { %v6789_v56 = vpop.f32.mrf.mxu1 }
 0x14c   : > { %v5537_v59 = vpop.f32.mrf.mxu0 }
 0x14d   : > { %v5569_v60 = vpop.f32.mrf.mxu1 }
 0x14e   : > { %v1757_v63 = vpop.f32.mrf.mxu0 }
 0x14f   : > { %v1967_v1 = vpop.f32.mrf.mxu1 }
 0x150   : > { %v5538_v32 = vpop.f32.mrf.mxu0 }
 0x151   : > { %v5570_v2 = vpop.f32.mrf.mxu1 }
 0x152   : > { %v1760_v5 = vpop.f32.mrf.mxu0  ;;  %v1544_v2 = vrot.slane %v6749_v24, 1  ;;  %v1374_v24 = vadd.f32 %v6744_v21, %v6713_v31  ;;  %v1377_v21 = vadd.f32 %v6755_v58, %v6720_v45 }
 0x153   : > { %v1970_v6 = vpop.f32.mrf.mxu1  ;;  %v1545_v5 = vrot.slane %v6753_v33, 1 }
 0x154   : > { %v6791_v7 = vpop.f32.mrf.mxu0 }
 0x155   : > { %v6793_v9 = vpop.f32.mrf.mxu1  ;;  %v1567_v29 = vsel %vm911_vm0, %v1544_v2, %v1545_v5 }
 0x156   : > { %v6795_v11 = vpop.f32.mrf.mxu0 }
 0x157   : > { %v6797_v12 = vpop.f32.mrf.mxu1 }
 0x158   : > { %v5542_v13 = vpop.f32.mrf.mxu0 }
 0x159   : > { %v5574_v14 = vpop.f32.mrf.mxu1 }
 0x15a   : > { %v1774_v43 = vpop.f32.mrf.mxu0  ;;  %v1566_v14 = vsel %vm911_vm0, %v1546_v46, %v1547_v54  ;;  %v1568_v46 = vadd.f32 %v1567_v29, %v1374_v24  ;;  %v1555_v24 = vrot.slane %v6775_v44, 1 }
 0x15b   : > { %v1984_v15 = vpop.f32.mrf.mxu1 }
 0x15c   : > { %v6799_v17 = vpop.f32.mrf.mxu0  ;;  %v1375_v15 = vadd.f32 %v6737_v18, %v6710_v27  ;;  %v1549_v27 = vrot.slane %v6765_v38, 1  ;;  %v1812_v18 = vadd.f32 %v1757_v63, %v1568_v46  ;;  %v6841_v38 = vld [vmem:[%s7482_s2] ss:$0 sm:$0xff] }
 0x15d   : > { %v6801_v19 = vpop.f32.mrf.mxu1 }
 0x15e   : > { %v6803_v48 = vpop.f32.mrf.mxu0  ;;  %v2022_v29 = vadd.f32 %v1967_v1, %v1812_v18 }
 0x15f   : > { %v6805_v23 = vpop.f32.mrf.mxu1 }
 0x160   : > { %v5546_v25 = vpop.f32.mrf.mxu0 }
 0x161   : > { %v5578_v30 = vpop.f32.mrf.mxu1 }
 0x162   : > { %v1788_v37 = vpop.f32.mrf.mxu0  ;;  %v1569_v30 = vadd.f32 %v1566_v14, %v1375_v15  ;;  %v1376_v15 = vadd.f32 %v6759_v35, %v6723_v50  ;;  %v1552_v50 = vrot.slane %v6773_v42, 1  ;;  %v1553_v35 = vrot.slane %v6777_v47, 1 }
 0x163   : > { %v1998_v0 = vpop.f32.mrf.mxu1  ;;  %v1550_v37 = vrot.slane %v6757_v34, 1 }
 0x164   : > { %v6807_v16 = vpop.f32.mrf.mxu0  ;;  %v1551_v0 = vrot.slane %v6763_v10, 1 }
 0x165   : > { %v6810_v26 = vpop.f32.mrf.mxu1 }
 0x166   : > { %v6812_v32 = vpop.f32.mrf.mxu0  ;;  %v1564_v2 = vsel %vm911_vm0, %v1550_v37, %v1551_v0 }
 0x167   : > { %v6816_v6 = vpop.f32.mrf.mxu1  ;;  %v1571_v45 = vadd.f32 %v1564_v2, %v1377_v21 }
 0x168   : > { %v5550_v13 = vpop.f32.mrf.mxu0 }
 0x169   : > { %v5582_v43 = vpop.f32.mrf.mxu1  ;;  %v1813_v13 = vadd.f32 %v5537_v59, %v1569_v30 }
 0x16a   : > { %v1802_v20 = vpop.f32.mrf.mxu0  ;;  %v1548_v43 = vrot.slane %v6761_v36, 1 }
 0x16b   : > { %v2012_v25 = vpop.f32.mrf.mxu1  ;;  %v2023_v34 = vadd.f32 %v5569_v60, %v1813_v13 }
 0x16c   : > { %v5601_v33 = vpop.f32.mrf.mxu0  ;;  %v1565_v10 = vsel %vm911_vm0, %v1548_v43, %v1549_v27  ;;  %v1554_v25 = vrot.slane %v6769_v40, 1  ;;  %v1379_v43 = vadd.f32 %v6767_v39, %v6730_v3 }
 0x16d   : > { %v2194_v5 = vrot.slane %v5601_v33, 1  ;;  %v1815_v33 = vadd.f32 %v6791_v7, %v1571_v45  ;;  %v1570_v37 = vadd.f32 %v1565_v10, %v1376_v15  ;;  %v1556_v45 = vrot.slane %v6785_v53, 1 }
 0x16e   : > { %v2129_v54 = vpop.f32.mrf.mxu0  ;;  %v1562_v7 = vsel %vm911_vm0, %v1554_v25, %v1555_v24  ;;  %v1381_v24 = vadd.f32 %v6779_v49, %v6746_v22 }
 0x16f   : > { %v2192_v59 = vrot.slane %v2129_v54, 1  ;;  %v1814_v1 = vadd.f32 %v6795_v11, %v1570_v37  ;;  %v2025_v42 = vadd.f32 %v6793_v9, %v1815_v33  ;;  %v1559_v9 = vrot.slane %v6787_v55, 1 }
 0x170   : > { %v5602_v20 = vpop.f32.mrf.mxu0  ;;  %v1380_v37 = vadd.f32 %v6783_v52, %v6751_v28 }
 0x171   : > { %v2195_v31 = vrot.slane %v5602_v20, 1  ;;  %v1378_v20 = vadd.f32 %v6771_v41, %v6733_v8  ;;  %v2024_v21 = vadd.f32 %v6797_v12, %v1814_v1  ;;  %v1558_v41 = vrot.slane %v6781_v51, 1 }
 0x172   : > { %v2132_v14 = vpop.f32.mrf.mxu0 }
 0x173   : > { %v2214_v36 = vsel %vm911_vm0, %v2194_v5, %v2195_v31  ;;  %v2193_v63 = vrot.slane %v2132_v14, 1  ;;  %v1563_v5 = vsel %vm911_vm0, %v1552_v50, %v1553_v35 }
 0x174   : > { %v2217_v58 = vadd.f32 %v2214_v36, %v2023_v34  ;;  %v5605_v60 = vpop.f32.mrf.mxu0  ;;  %v1573_v34 = vadd.f32 %v1562_v7, %v1379_v43 }
 0x175   : > { %v2215_v30 = vsel %vm911_vm0, %v2192_v59, %v2193_v63  ;;  %v2198_v27 = vrot.slane %v5605_v60, 1  ;;  %v1572_v63 = vadd.f32 %v1563_v5, %v1378_v20  ;;  %v6119_v20 = vld [vmem:[%s7483_s3 + $0xf0] sm:$0xff]  }
 0x176   : > { %v2232_v0 = vadd.f32 %v6841_v38, %v2217_v58  ;;  %v2216_v13 = vadd.f32 %v2215_v30, %v2022_v29  ;;  %v2145_v46 = vpop.f32.mrf.mxu0  ;;  %v1817_v36 = vadd.f32 %v6799_v17, %v1573_v34  ;;  %v1557_v58 = vrot.slane %v6789_v56, 1  ;;  %v6122_v34 = vld [vmem:[%s7483_s3 + $0xe8] sm:$0xff]  }
 0x177   : > { %v2196_v31 = vrot.slane %v2145_v46, 1  ;;  %v1816_v60 = vadd.f32 %v6803_v48, %v1572_v63  ;;  %v1560_v17 = vsel %vm911_vm0, %v1558_v41, %v1559_v9  ;;  %v6124_v41 = vld [vmem:[%s7483_s3 + $0xa0] sm:$0xff]  }
 0x178   : > { %v2240_v54 = vmax.f32 %v2232_v0, 0.0  ;;  %v2231_v40 = vadd.f32 %v6841_v38, %v2216_v13  ;;  %v5606_v44 = vpop.f32.mrf.mxu0  ;;  %v2027_v53 = vadd.f32 %v6801_v19, %v1817_v36  ;;  %v1561_v13 = vsel %vm911_vm0, %v1556_v45, %v1557_v58 }
 0x179   : > { %v2199_v18 = vrot.slane %v5606_v44, 1  ;;  %v2026_v50 = vadd.f32 %v6805_v23, %v1816_v60  ;;  %v1575_v35 = vadd.f32 %v1560_v17, %v1381_v24  ;;  %v1574_v44 = vadd.f32 %v1561_v13, %v1380_v37  ;;  %v6118_v23 = vld [vmem:[%s7483_s3 + $0xb0] sm:$0xff]   ;;  %v6127_v60 = vld [vmem:[%s7483_s3 + $0x98] sm:$0xff]   ;;  %v6136_v37 = vld [vmem:[%s7483_s3 + $0x80] sm:$0xff]  }
 0x17a   : > { %v2248_v47 = vpack.c.bf16 %v2240_v54, %v2240_v54  ;;  %v2239_v2 = vmax.f32 %v2231_v40, 0.0  ;;  %v2148_v11 = vpop.f32.mrf.mxu0  ;;  %v6131_v17 = vld [vmem:[%s7483_s3 + $0xd0] sm:$0xff]   ;;  %v6140_v13 = vld [vmem:[%s7483_s3 + $0x178] sm:$0xff]  }
 0x17b   : > { %v2212_v3 = vsel %vm911_vm0, %v2198_v27, %v2199_v18  ;;  %v2197_v39 = vrot.slane %v2148_v11, 1  ;;  %v1819_v40 = vadd.f32 %v6807_v16, %v1575_v35  ;;  %v1818_v16 = vadd.f32 %v6812_v32, %v1574_v44  ;;  %v6121_v32 = vld [vmem:[%s7483_s3 + $0xa8] sm:$0xff]   ;;  %v6142_v35 = vld [vmem:[%s7483_s3 + $0x130] sm:$0xff]  }
 0x17c   : > { %2257 = vst [vmem:[#allocation2 + $0x10] sm:$0xf] %v2248_v47  ;;  %v2247_v14 = vpack.c.bf16 %v2239_v2, %v2239_v2  ;;  %v2219_v10 = vadd.f32 %v2212_v3, %v2025_v42  ;;  %v5609_v8 = vpop.f32.mrf.mxu0 }
 0x17d   : > { %v2213_v59 = vsel %vm911_vm0, %v2196_v31, %v2197_v39  ;;  %v2202_v30 = vrot.slane %v5609_v8, 1  ;;  %v2029_v31 = vadd.f32 %v6810_v26, %v1819_v40  ;;  %v2028_v26 = vadd.f32 %v6816_v6, %v1818_v16  ;;  %v6152_v16 = vld [vmem:[%s7483_s3 + $0x158] sm:$0xff]  }
 0x17e   : > { %2256 = vst [vmem:[#allocation2 + $0x8] sm:$0xf] %v2247_v14  ;;  %v2234_v15 = vadd.f32 %v6841_v38, %v2219_v10  ;;  %v2218_v29 = vadd.f32 %v2213_v59, %v2024_v21  ;;  %v2161_v12 = vpop.f32.mrf.mxu0 }
 0x17f   : > { %v2200_v46 = vrot.slane %v2161_v12, 1 }
 0x180   : > { %v2242_v51 = vmax.f32 %v2234_v15, 0.0  ;;  %v2233_v55 = vadd.f32 %v6841_v38, %v2218_v29  ;;  %v5610_v25 = vpop.f32.mrf.mxu0  ;;  %v6125_v15 = vld [vmem:[%s7483_s3 + $0xe0] sm:$0xff]  }
 0x181   : > { %v2203_v33 = vrot.slane %v5610_v25, 1 }
 0x182   : > { %v2250_v56 = vpack.c.bf16 %v2242_v51, %v2242_v51  ;;  %v2241_v0 = vmax.f32 %v2233_v55, 0.0  ;;  %v2164_v48 = vpop.f32.mrf.mxu0  ;;  %v6128_v51 = vld [vmem:[%s7483_s3 + $0xd8] sm:$0xff]   ;;  %v6130_v55 = vld [vmem:[%s7483_s3 + $0x90] sm:$0xff]  }
 0x183   : > { %v2210_v22 = vsel %vm911_vm0, %v2202_v30, %v2203_v33  ;;  %v2201_v49 = vrot.slane %v2164_v48, 1  ;;  %v6895_v18 = vld [vmem:[#allocation2 + $0x10] sm:$0xff]   ;;  %v6133_v30 = vld [vmem:[%s7483_s3 + $0x88] sm:$0xff]   ;;  %v6139_v48 = vld [vmem:[%s7483_s3 + $0x138] sm:$0xff]  }
 0x184   : > { %2259 = vst [vmem:[#allocation2 + $0x20] sm:$0xf] %v2250_v56  ;;  %v2249_v1 = vpack.c.bf16 %v2241_v0, %v2241_v0  ;;  %v2221_v54 = vadd.f32 %v2210_v22, %v2027_v53  ;;  %v5613_v28 = vpop.f32.mrf.mxu0  ;;  %v6134_v33 = vld [vmem:[%s7483_s3 + $0xc8] sm:$0xff]   ;;  %v6137_v0 = vld [vmem:[%s7483_s3 + $0xc0] sm:$0xff]  }
 0x185   : > { %v2211_v52 = vsel %vm911_vm0, %v2200_v46, %v2201_v49  ;;  %v6891_v19 = vld [vmem:[#allocation2 + $0x8] sm:$0xff]   ;;  %v2206_v11 = vrot.slane %v5613_v28, 1  ;;  %v6985_v46 = vpop.f32.mrf.mxu1  ;;  %v6989_v49 = vld [vmem:[#allocation2 + $0x10] sm:$0xff]  }
 0x186   : > { %2258 = vst [vmem:[#allocation2 + $0x18] sm:$0xf] %v2249_v1  ;;  %v2236_v43 = vadd.f32 %v6841_v38, %v2221_v54  ;;  %v2220_v7 = vadd.f32 %v2211_v52, %v2026_v50  ;;  %v2177_v27 = vpop.f32.mrf.mxu0  ;;  %5664 = vmatmul.mubr.bf16.vlgmr.msra.gmra.mxu0 %v6891_v19  ;;  %5696 = vmatmul.mubr.bf16.vlgmr.msra.gmra.mxu1 %v6891_v19  ;;  %v6970_v56 = vld [vmem:[#allocation2 + $0x8] sm:$0xff]   ;;  %v6143_v1 = vld [vmem:[%s7483_s3 + $0x170] sm:$0xff]  }
 0x187   : > { %5667 = vmatprep.mubr.bf16.mxu0 %v6895_v18  ;;  %5699 = vmatprep.mubr.bf16.mxu1 %v6895_v18  ;;  %v2204_v14 = vrot.slane %v2177_v27, 1  ;;  %v6987_v22 = vpop.f32.mrf.mxu1  ;;  %v6145_v28 = vld [vmem:[%s7483_s3 + $0x128] sm:$0xff]   ;;  %v6149_v27 = vld [vmem:[%s7483_s3 + $0x160] sm:$0xff]  }
 0x188   : > { %v2244_v42 = vmax.f32 %v2236_v43, 0.0  ;;  %v2235_v47 = vadd.f32 %v6841_v38, %v2220_v7  ;;  %v5614_v2 = vpop.f32.mrf.mxu0  ;;  %5712 = vmatpush3.bf16.msra.mxu0 %v6689_v61  ;;  %5744 = vmatpush3.bf16.msra.mxu1 %v6694_v62  ;;  %v6146_v52 = vld [vmem:[%s7483_s3 + $0x168] sm:$0xff]   ;;  %v6148_v7 = vld [vmem:[%s7483_s3 + $0x120] sm:$0xff]  }
 0x189   : > { %v2207_v5 = vrot.slane %v5614_v2, 1  ;;  %5713 = vmatprep.subr.bf16.mxu0 %v6118_v23  ;;  %5745 = vmatprep.subr.bf16.mxu1 %v6119_v20 }
 0x18a   : > { %v2252_v3 = vpack.c.bf16 %v2244_v42, %v2244_v42  ;;  %v2243_v39 = vmax.f32 %v2235_v47, 0.0  ;;  %v2180_v21 = vpop.f32.mrf.mxu0 }
 0x18b   : > { %v2208_v61 = vsel %vm911_vm0, %v2206_v11, %v2207_v5  ;;  %v2205_v62 = vrot.slane %v2180_v21, 1  ;;  %v6929_v6 = vld [vmem:[#allocation2 + $0x20] sm:$0xff]   ;;  %v6154_v5 = vld [vmem:[%s7483_s3 + $0x110] sm:$0xff]   ;;  %v6157_v21 = vld [vmem:[%s7483_s3 + $0x108] sm:$0xff]  }
 0x18c   : > { %2261 = vst [vmem:[#allocation2 + $0x30] sm:$0xf] %v2252_v3  ;;  %v2251_v10 = vpack.c.bf16 %v2243_v39, %v2243_v39  ;;  %v2223_v8 = vadd.f32 %v2208_v61, %v2029_v31  ;;  %5714 = vmatpush3.bf16.msra.mxu0 %v6118_v23  ;;  %5746 = vmatpush3.bf16.msra.mxu1 %v6119_v20  ;;  %v7013_v44 = vld [vmem:[#allocation2 + $0x20] sm:$0xff]   ;;  %v6151_v20 = vld [vmem:[%s7483_s3 + $0x118] sm:$0xff]   ;;  %v6155_v31 = vld [vmem:[%s7483_s3 + $0x150] sm:$0xff]  }
 0x18d   : > { %v2209_v9 = vsel %vm911_vm0, %v2204_v14, %v2205_v62  ;;  %v6926_v59 = vld [vmem:[#allocation2 + $0x18] sm:$0xff]   ;;  %5715 = vmatprep.subr.bf16.mxu0 %v6121_v32  ;;  %5747 = vmatprep.subr.bf16.mxu1 %v6122_v34  ;;  %v6159_v62 = vld [vmem:[%s7483_s3 + $0x100] sm:$0xff]  }
 0x18e   : > { %2260 = vst [vmem:[#allocation2 + $0x28] sm:$0xf] %v2251_v10  ;;  %v2238_v36 = vadd.f32 %v6841_v38, %v2223_v8  ;;  %v2222_v63 = vadd.f32 %v2209_v9, %v2028_v26  ;;  %5668 = vmatmul.mubr.bf16.gmra.mxu0 %v6926_v59  ;;  %5700 = vmatmul.mubr.bf16.gmra.mxu1 %v6926_v59  ;;  %v6991_v50 = vld [vmem:[#allocation2 + $0x18] sm:$0xff]   ;;  %v6160_v26 = vld [vmem:[%s7483_s3 + $0x140] sm:$0xff]  }
 0x18f   : > { %5671 = vmatprep.mubr.bf16.mxu0 %v6929_v6  ;;  %5703 = vmatprep.mubr.bf16.mxu1 %v6929_v6  ;;  %v6162_v9 = vld [vmem:[%s7483_s3 + $0x1f8] sm:$0xff]  }
 0x190   : > { %v2246_v29 = vmax.f32 %v2238_v36, 0.0  ;;  %v2237_v12 = vadd.f32 %v6841_v38, %v2222_v63  ;;  %5716 = vmatpush3.bf16.msra.mxu0 %v6121_v32  ;;  %5748 = vmatpush3.bf16.msra.mxu1 %v6122_v34  ;;  %v6158_v32 = vld [vmem:[%s7483_s3 + $0x148] sm:$0xff]   ;;  %v6164_v36 = vld [vmem:[%s7483_s3 + $0x1f0] sm:$0xff]  }
 0x191   : > { %5717 = vmatprep.subr.bf16.mxu0 %v6124_v41  ;;  %5749 = vmatprep.subr.bf16.mxu1 %v6125_v15  ;;  %v6165_v63 = vld [vmem:[%s7483_s3 + $0x1a8] sm:$0xff]  }
 0x192   : > { %v2254_v45 = vpack.c.bf16 %v2246_v29, %v2246_v29  ;;  %v2245_v58 = vmax.f32 %v2237_v12, 0.0  ;;  %v6168_v29 = vld [vmem:[%s7483_s3 + $0x1e0] sm:$0xff]   ;;  %v6169_v12 = vld [vmem:[%s7483_s3 + $0x198] sm:$0xff]  }
 0x193   : > { %v6950_v24 = vld [vmem:[#allocation2 + $0x30] sm:$0xff]  }
 0x194   : > { %2263 = vst [vmem:[#allocation2 + $0x40] sm:$0xf] %v2254_v45  ;;  %v2253_v38 = vpack.c.bf16 %v2245_v58, %v2245_v58  ;;  %5718 = vmatpush3.bf16.msra.mxu0 %v6124_v41  ;;  %5750 = vmatpush3.bf16.msra.mxu1 %v6125_v15  ;;  %v7037_v2 = vld [vmem:[#allocation2 + $0x30] sm:$0xff]   ;;  %v6161_v41 = vld [vmem:[%s7483_s3 + $0x1b8] sm:$0xff]   ;;  %v6167_v15 = vld [vmem:[%s7483_s3 + $0x1a0] sm:$0xff]  }
 0x195   : > { %v6948_v25 = vld [vmem:[#allocation2 + $0x28] sm:$0xff]   ;;  %5719 = vmatprep.subr.bf16.mxu0 %v6127_v60  ;;  %5751 = vmatprep.subr.bf16.mxu1 %v6128_v51  ;;  %v6170_v45 = vld [vmem:[%s7483_s3 + $0x1d8] sm:$0xff]   ;;  %v6171_v58 = vld [vmem:[%s7483_s3 + $0x190] sm:$0xff]  }
 0x196   : > { %2262 = vst [vmem:[#allocation2 + $0x38] sm:$0xf] %v2253_v38  ;;  %5672 = vmatmul.mubr.bf16.gmra.mxu0 %v6948_v25  ;;  %5704 = vmatmul.mubr.bf16.gmra.mxu1 %v6948_v25  ;;  %v7015_v43 = vld [vmem:[#allocation2 + $0x28] sm:$0xff]  }
 0x197   : > { %5675 = vmatprep.mubr.bf16.mxu0 %v6950_v24  ;;  %5707 = vmatprep.mubr.bf16.mxu1 %v6950_v24  ;;  %v6174_v38 = vld [vmem:[%s7483_s3 + $0x1c8] sm:$0xff]  }
 0x198   : > { %5720 = vmatpush3.bf16.msra.mxu0 %v6127_v60  ;;  %5752 = vmatpush3.bf16.msra.mxu1 %v6128_v51  ;;  %v6172_v60 = vld [vmem:[%s7483_s3 + $0x1d0] sm:$0xff]   ;;  %v6173_v51 = vld [vmem:[%s7483_s3 + $0x188] sm:$0xff]  }
 0x199   : > { %5721 = vmatprep.subr.bf16.mxu0 %v6130_v55  ;;  %5753 = vmatprep.subr.bf16.mxu1 %v6131_v17 }
 0x19b   : > { %v7061_v61 = vld [vmem:[#allocation2 + $0x40] sm:$0xff]  }
 0x19c   : > { %5722 = vmatpush3.bf16.msra.mxu0 %v6130_v55  ;;  %5754 = vmatpush3.bf16.msra.mxu1 %v6131_v17  ;;  %v7127_v55 = vld [vmem:[#allocation2 + $0x10] sm:$0xff]   ;;  %v6179_v17 = vld [vmem:[%s7483_s3 + $0x238] sm:$0xff]  }
 0x19d   : > { %v6968_v53 = vld [vmem:[#allocation2 + $0x38] sm:$0xff]   ;;  %5723 = vmatprep.subr.bf16.mxu0 %v6133_v30  ;;  %5755 = vmatprep.subr.bf16.mxu1 %v6134_v33 }
 0x19e   : > { %5676 = vmatmul.mubr.bf16.gmra.mxu0 %v6968_v53  ;;  %5708 = vmatmul.mubr.bf16.gmra.mxu1 %v6968_v53  ;;  %v7039_v11 = vld [vmem:[#allocation2 + $0x38] sm:$0xff]  }
 0x19f   : > { %5759 = vmatprep.mubr.bf16.mxu1 %v6970_v56  ;;  %5727 = vmatprep.mubr.bf16.mxu0 %v6682_v57  ;;  %v5634_v57 = vpop.f32.mrf.mxu1 }
 0x1a0   : > { %5724 = vmatpush3.bf16.msra.mxu0 %v6133_v30  ;;  %5756 = vmatpush3.bf16.msra.mxu1 %v6134_v33  ;;  %v6178_v30 = vld [vmem:[#allocation2 + $0x18] sm:$0xff]   ;;  %v6180_v33 = vld [vmem:[#allocation2 + $0x20] sm:$0xff]  }
 0x1a1   : > { %5725 = vmatprep.subr.bf16.mxu0 %v6136_v37  ;;  %5757 = vmatprep.subr.bf16.mxu1 %v6137_v0  ;;  %v2436_v54 = vpop.f32.mrf.mxu1  ;;  %v6188_v57 = vld [vmem:[#allocation2 + $0x40] sm:$0xff]  }
 0x1a2   : > { %v6192_v54 = vld [vmem:[%s7483_s3 + $0x200] sm:$0xff]  }
 0x1a4   : > { %5726 = vmatpush3.bf16.msra.mxu0 %v6136_v37  ;;  %5758 = vmatpush3.bf16.msra.mxu1 %v6137_v0  ;;  %v6181_v37 = vld [vmem:[%s7483_s3 + $0x230] sm:$0xff]  }
 0x1a5   : > { %5775 = vmatprep.subr.bf16.mxu0 %v6139_v48  ;;  %5807 = vmatprep.subr.bf16.mxu1 %v6140_v13  ;;  %v6184_v0 = vld [vmem:[#allocation2 + $0x30] sm:$0xff]  }
 0x1a7   : > { %5728 = vmatmul.mubr.bf16.vlgmr.msra.gmra.mxu0 %v6891_v19  ;;  %5760 = vmatmul.mubr.bf16.vlgmr.msra.gmra.mxu1 %v6989_v49  ;;  %v7009_v19 = vpop.f32.mrf.mxu1 }
 0x1a8   : > { %5731 = vmatprep.mubr.bf16.mxu0 %v6895_v18  ;;  %5763 = vmatprep.mubr.bf16.mxu1 %v6991_v50 }
 0x1a9   : > { %5776 = vmatpush3.bf16.msra.mxu0 %v6139_v48  ;;  %5808 = vmatpush3.bf16.msra.mxu1 %v6140_v13  ;;  %v7011_v40 = vpop.f32.mrf.mxu1  ;;  %v6185_v48 = vld [vmem:[%s7483_s3 + $0x220] sm:$0xff]   ;;  %v6187_v13 = vld [vmem:[%s7483_s3 + $0x218] sm:$0xff]  }
 0x1aa   : > { %5777 = vmatprep.subr.bf16.mxu0 %v6142_v35  ;;  %5809 = vmatprep.subr.bf16.mxu1 %v6143_v1 }
 0x1ab   : > { %v5638_v18 = vpop.f32.mrf.mxu1 }
 0x1ad   : > { %5778 = vmatpush3.bf16.msra.mxu0 %v6142_v35  ;;  %5810 = vmatpush3.bf16.msra.mxu1 %v6143_v1  ;;  %v2450_v23 = vpop.f32.mrf.mxu1  ;;  %v6191_v35 = vld [vmem:[%s7483_s3 + $0x208] sm:$0xff]  }
 0x1ae   : > { %5779 = vmatprep.subr.bf16.mxu0 %v6145_v28  ;;  %5811 = vmatprep.subr.bf16.mxu1 %v6146_v52  ;;  %v6190_v1 = vld [vmem:[#allocation2 + $0x48] sm:$0xff]  }
 0x1af   : > { %5732 = vmatmul.mubr.bf16.gmra.mxu0 %v6926_v59  ;;  %5764 = vmatmul.mubr.bf16.gmra.mxu1 %v7013_v44  ;;  %v7033_v42 = vpop.f32.mrf.mxu1  ;;  %v6163_v59 = vld [vmem:[%s7483_s3 + $0x1b0] sm:$0xff]  }
 0x1b0   : > { %5735 = vmatprep.mubr.bf16.mxu0 %v6929_v6  ;;  %5767 = vmatprep.mubr.bf16.mxu1 %v7015_v43  ;;  %v6166_v6 = vld [vmem:[%s7483_s3 + $0x1e8] sm:$0xff]  }
 0x1b1   : > { %5780 = vmatpush3.bf16.msra.mxu0 %v6145_v28  ;;  %5812 = vmatpush3.bf16.msra.mxu1 %v6146_v52  ;;  %v7035_v47 = vpop.f32.mrf.mxu1 }
 0x1b2   : > { %5781 = vmatprep.subr.bf16.mxu0 %v6148_v7  ;;  %5813 = vmatprep.subr.bf16.mxu1 %v6149_v27 }
 0x1b3   : > { %v5642_v3 = vpop.f32.mrf.mxu1 }
 0x1b5   : > { %5782 = vmatpush3.bf16.msra.mxu0 %v6148_v7  ;;  %5814 = vmatpush3.bf16.msra.mxu1 %v6149_v27  ;;  %v2464_v39 = vpop.f32.mrf.mxu1 }
 0x1b6   : > { %5783 = vmatprep.subr.bf16.mxu0 %v6151_v20  ;;  %5815 = vmatprep.subr.bf16.mxu1 %v6152_v16 }
 0x1b7   : > { %5736 = vmatmul.mubr.bf16.gmra.mxu0 %v6948_v25  ;;  %5768 = vmatmul.mubr.bf16.gmra.mxu1 %v7037_v2  ;;  %v7057_v34 = vpop.f32.mrf.mxu1  ;;  %v6176_v25 = vld [vmem:[%s7483_s3 + $0x180] sm:$0xff]  }
 0x1b8   : > { %5739 = vmatprep.mubr.bf16.mxu0 %v6950_v24  ;;  %5771 = vmatprep.mubr.bf16.mxu1 %v7039_v11  ;;  %v6177_v24 = vld [vmem:[%s7483_s3 + $0x1c0] sm:$0xff]  }
 0x1b9   : > { %5784 = vmatpush3.bf16.msra.mxu0 %v6151_v20  ;;  %5816 = vmatpush3.bf16.msra.mxu1 %v6152_v16  ;;  %v7059_v14 = vpop.f32.mrf.mxu1 }
 0x1ba   : > { %5785 = vmatprep.subr.bf16.mxu0 %v6154_v5  ;;  %5817 = vmatprep.subr.bf16.mxu1 %v6155_v31 }
 0x1bb   : > { %v5646_v10 = vpop.f32.mrf.mxu1 }
 0x1bd   : > { %5786 = vmatpush3.bf16.msra.mxu0 %v6154_v5  ;;  %5818 = vmatpush3.bf16.msra.mxu1 %v6155_v31  ;;  %v2478_v8 = vpop.f32.mrf.mxu1 }
 0x1be   : > { %5787 = vmatprep.subr.bf16.mxu0 %v6157_v21  ;;  %5819 = vmatprep.subr.bf16.mxu1 %v6158_v32 }
 0x1bf   : > { %5740 = vmatmul.mubr.bf16.gmra.mxu0 %v6968_v53  ;;  %5772 = vmatmul.mubr.bf16.gmra.mxu1 %v7061_v61  ;;  %v6183_v53 = vld [vmem:[%s7483_s3 + $0x228] sm:$0xff]  }
 0x1c0   : > { %5791 = vmatprep.mubr.bf16.mxu0 %v6970_v56  ;;  %5823 = vmatprep.mubr.bf16.mxu1 %v6970_v56  ;;  %v6182_v56 = vld [vmem:[#allocation2 + $0x28] sm:$0xff]  }
 0x1c1   : > { %5788 = vmatpush3.bf16.msra.mxu0 %v6157_v21  ;;  %5820 = vmatpush3.bf16.msra.mxu1 %v6158_v32 }
 0x1c2   : > { %5789 = vmatprep.subr.bf16.mxu0 %v6159_v62  ;;  %5821 = vmatprep.subr.bf16.mxu1 %v6160_v26 }
 0x1c5   : > { %5790 = vmatpush3.bf16.msra.mxu0 %v6159_v62  ;;  %5822 = vmatpush3.bf16.msra.mxu1 %v6160_v26 }
 0x1c6   : > { %5839 = vmatprep.subr.bf16.mxu0 %v6161_v41  ;;  %5871 = vmatprep.subr.bf16.mxu1 %v6162_v9 }
 0x1c8   : > { %5792 = vmatmul.mubr.bf16.vlgmr.msra.gmra.mxu0 %v6989_v49  ;;  %5824 = vmatmul.mubr.bf16.vlgmr.msra.gmra.mxu1 %v6989_v49  ;;  %v6186_v49 = vld [vmem:[#allocation2 + $0x38] sm:$0xff]  }
 0x1c9   : > { %5795 = vmatprep.mubr.bf16.mxu0 %v6991_v50  ;;  %5827 = vmatprep.mubr.bf16.mxu1 %v6991_v50  ;;  %v6189_v50 = vld [vmem:[%s7483_s3 + $0x210] sm:$0xff]  }
 0x1ca   : > { %5840 = vmatpush3.bf16.msra.mxu0 %v6161_v41  ;;  %5872 = vmatpush3.bf16.msra.mxu1 %v6162_v9 }
 0x1cb   : > { %5841 = vmatprep.subr.bf16.mxu0 %v6163_v59  ;;  %5873 = vmatprep.subr.bf16.mxu1 %v6164_v36 }
 0x1ce   : > { %5842 = vmatpush3.bf16.msra.mxu0 %v6163_v59  ;;  %5874 = vmatpush3.bf16.msra.mxu1 %v6164_v36 }
 0x1cf   : > { %5843 = vmatprep.subr.bf16.mxu0 %v6165_v63  ;;  %5875 = vmatprep.subr.bf16.mxu1 %v6166_v6 }
 0x1d0   : > { %5796 = vmatmul.mubr.bf16.gmra.mxu0 %v7013_v44  ;;  %5828 = vmatmul.mubr.bf16.gmra.mxu1 %v7013_v44 }
 0x1d1   : > { %5799 = vmatprep.mubr.bf16.mxu0 %v7015_v43  ;;  %5831 = vmatprep.mubr.bf16.mxu1 %v7015_v43 }
 0x1d2   : > { %5844 = vmatpush3.bf16.msra.mxu0 %v6165_v63  ;;  %5876 = vmatpush3.bf16.msra.mxu1 %v6166_v6 }
 0x1d3   : > { %5845 = vmatprep.subr.bf16.mxu0 %v6167_v15  ;;  %5877 = vmatprep.subr.bf16.mxu1 %v6168_v29 }
 0x1d6   : > { %5846 = vmatpush3.bf16.msra.mxu0 %v6167_v15  ;;  %5878 = vmatpush3.bf16.msra.mxu1 %v6168_v29 }
 0x1d7   : > { %5847 = vmatprep.subr.bf16.mxu0 %v6169_v12  ;;  %5879 = vmatprep.subr.bf16.mxu1 %v6170_v45 }
 0x1d8   : > { %5800 = vmatmul.mubr.bf16.gmra.mxu0 %v7037_v2  ;;  %5832 = vmatmul.mubr.bf16.gmra.mxu1 %v7037_v2 }
 0x1d9   : > { %5803 = vmatprep.mubr.bf16.mxu0 %v7039_v11  ;;  %5835 = vmatprep.mubr.bf16.mxu1 %v7039_v11 }
 0x1da   : > { %5848 = vmatpush3.bf16.msra.mxu0 %v6169_v12  ;;  %5880 = vmatpush3.bf16.msra.mxu1 %v6170_v45 }
 0x1db   : > { %5849 = vmatprep.subr.bf16.mxu0 %v6171_v58  ;;  %5881 = vmatprep.subr.bf16.mxu1 %v6172_v60 }
 0x1de   : > { %5850 = vmatpush3.bf16.msra.mxu0 %v6171_v58  ;;  %5882 = vmatpush3.bf16.msra.mxu1 %v6172_v60 }
 0x1df   : > { %5851 = vmatprep.subr.bf16.mxu0 %v6173_v51  ;;  %5883 = vmatprep.subr.bf16.mxu1 %v6174_v38 }
 0x1e0   : > { %5804 = vmatmul.mubr.bf16.gmra.mxu0 %v7061_v61  ;;  %5836 = vmatmul.mubr.bf16.gmra.mxu1 %v7061_v61 }
 0x1e1   : > { %5855 = vmatprep.mubr.bf16.mxu0 %v7127_v55  ;;  %5887 = vmatprep.mubr.bf16.mxu1 %v7127_v55 }
 0x1e2   : > { %5852 = vmatpush3.bf16.msra.mxu0 %v6173_v51  ;;  %5884 = vmatpush3.bf16.msra.mxu1 %v6174_v38 }
 0x1e3   : > { %5853 = vmatprep.subr.bf16.mxu0 %v6176_v25  ;;  %5885 = vmatprep.subr.bf16.mxu1 %v6177_v24 }
 0x1e6   : > { %5854 = vmatpush3.bf16.msra.mxu0 %v6176_v25  ;;  %5886 = vmatpush3.bf16.msra.mxu1 %v6177_v24 }
 0x1e7   : > { %5903 = vmatprep.subr.bf16.mxu0 %v6179_v17  ;;  %5935 = vmatprep.subr.bf16.mxu1 %v6179_v17 }
 0x1e9   : > { %5856 = vmatmul.mubr.bf16.vlgmr.msra.gmra.mxu0 %v6178_v30  ;;  %5888 = vmatmul.mubr.bf16.vlgmr.msra.gmra.mxu1 %v6178_v30 }
 0x1ea   : > { %5859 = vmatprep.mubr.bf16.mxu0 %v6180_v33  ;;  %5891 = vmatprep.mubr.bf16.mxu1 %v6180_v33 }
 0x1eb   : > { %5904 = vmatpush3.bf16.msra.mxu0 %v6179_v17  ;;  %5943 = vmatpush3.bf16.msra.mxu1 %v6179_v17 }
 0x1ec   : > { %5905 = vmatprep.subr.bf16.mxu0 %v6181_v37  ;;  %5936 = vmatprep.subr.bf16.mxu1 %v6181_v37 }
 0x1ef   : > { %5906 = vmatpush3.bf16.msra.mxu0 %v6181_v37  ;;  %5944 = vmatpush3.bf16.msra.mxu1 %v6181_v37 }
 0x1f0   : > { %5907 = vmatprep.subr.bf16.mxu0 %v6183_v53  ;;  %5937 = vmatprep.subr.bf16.mxu1 %v6183_v53 }
 0x1f1   : > { %5860 = vmatmul.mubr.bf16.gmra.mxu0 %v6182_v56  ;;  %5892 = vmatmul.mubr.bf16.gmra.mxu1 %v6182_v56 }
 0x1f2   : > { %5863 = vmatprep.mubr.bf16.mxu0 %v6184_v0  ;;  %5895 = vmatprep.mubr.bf16.mxu1 %v6184_v0 }
 0x1f3   : > { %5908 = vmatpush3.bf16.msra.mxu0 %v6183_v53  ;;  %5945 = vmatpush3.bf16.msra.mxu1 %v6183_v53 }
 0x1f4   : > { %5909 = vmatprep.subr.bf16.mxu0 %v6185_v48  ;;  %5938 = vmatprep.subr.bf16.mxu1 %v6185_v48 }
 0x1f7   : > { %5910 = vmatpush3.bf16.msra.mxu0 %v6185_v48  ;;  %5946 = vmatpush3.bf16.msra.mxu1 %v6185_v48 }
 0x1f8   : > { %5911 = vmatprep.subr.bf16.mxu0 %v6187_v13  ;;  %5939 = vmatprep.subr.bf16.mxu1 %v6187_v13 }
 0x1f9   : > { %5864 = vmatmul.mubr.bf16.gmra.mxu0 %v6186_v49  ;;  %5896 = vmatmul.mubr.bf16.gmra.mxu1 %v6186_v49 }
 0x1fa   : > { %5867 = vmatprep.mubr.bf16.mxu0 %v6188_v57  ;;  %5899 = vmatprep.mubr.bf16.mxu1 %v6188_v57 }
 0x1fb   : > { %5912 = vmatpush3.bf16.msra.mxu0 %v6187_v13  ;;  %5947 = vmatpush3.bf16.msra.mxu1 %v6187_v13 }
 0x1fc   : > { %5913 = vmatprep.subr.bf16.mxu0 %v6189_v50  ;;  %5940 = vmatprep.subr.bf16.mxu1 %v6189_v50 }
 0x1ff   : > { %5914 = vmatpush3.bf16.msra.mxu0 %v6189_v50  ;;  %5948 = vmatpush3.bf16.msra.mxu1 %v6189_v50 }
 0x200   : > { %5915 = vmatprep.subr.bf16.mxu0 %v6191_v35  ;;  %5941 = vmatprep.subr.bf16.mxu1 %v6191_v35 }
 0x201   : > { %5868 = vmatmul.mubr.bf16.gmra.mxu0 %v6190_v1  ;;  %5900 = vmatmul.mubr.bf16.gmra.mxu1 %v6190_v1 }
 0x202   : > { %5919 = vmatprep.mubr.bf16.mxu0 %v7127_v55  ;;  %5927 = vmatprep.mubr.bf16.mxu1 %v6184_v0 }
 0x203   : > { %5916 = vmatpush3.bf16.msra.mxu0 %v6191_v35  ;;  %5949 = vmatpush3.bf16.msra.mxu1 %v6191_v35 }
 0x204   : > { %5917 = vmatprep.subr.bf16.mxu0 %v6192_v54  ;;  %5942 = vmatprep.subr.bf16.mxu1 %v6192_v54 }
 0x207   : > { %5918 = vmatpush3.bf16.msra.mxu0 %v6192_v54  ;;  %5950 = vmatpush3.bf16.msra.mxu1 %v6192_v54 }
 0x20a   : > { %5920 = vmatmul.mubr.bf16.vlgmr.msra.gmra.mxu0 %v6178_v30  ;;  %5928 = vmatmul.mubr.bf16.vlgmr.msra.gmra.mxu1 %v6186_v49 }
 0x20b   : > { %5923 = vmatprep.mubr.bf16.mxu0 %v6180_v33  ;;  %5931 = vmatprep.mubr.bf16.mxu1 %v6188_v57 }
 0x212   : > { %5924 = vmatmul.mubr.bf16.gmra.mxu0 %v6182_v56  ;;  %5932 = vmatmul.mubr.bf16.gmra.mxu1 %v6190_v1 }
 0x246   : > { %v5665_v28 = vpop.f32.mrf.mxu0  ;;  %v5697_v52 = vpop.f32.mrf.mxu1 }
 0x247   : > { %v2715_v20 = vrot.slane %v5665_v28, 7 }
 0x248   : > { %v2650_v44 = vpop.f32.mrf.mxu0  ;;  %v2845_v43 = vpop.f32.mrf.mxu1 }
 0x249   : > { %v2713_v35 = vrot.slane %v2650_v44, 7 }
 0x24a   : > { %v5666_v7 = vpop.f32.mrf.mxu0  ;;  %v5698_v27 = vpop.f32.mrf.mxu1 }
 0x24b   : > { %v2716_v21 = vrot.slane %v5666_v7, 7 }
 0x24c   : > { %v2653_v18 = vpop.f32.mrf.mxu0  ;;  %v2848_v23 = vpop.f32.mrf.mxu1 }
 0x24d   : > { %v2714_v16 = vrot.slane %v2653_v18, 7 }
 0x24e   : > { %v5669_v2 = vpop.f32.mrf.mxu0  ;;  %v5701_v11 = vpop.f32.mrf.mxu1 }
 0x24f   : > { %v2736_v5 = vsel %vm2729_vm1, %v2714_v16, %v2715_v20  ;;  %v2719_v9 = vrot.slane %v5669_v2, 7 }
 0x250   : > { %v7167_v31 = vadd.f32 %v5697_v52, %v2736_v5  ;;  %v2666_v3 = vpop.f32.mrf.mxu0  ;;  %v2859_v39 = vpop.f32.mrf.mxu1 }
 0x251   : > { %v2717_v32 = vrot.slane %v2666_v3, 7 }
 0x252   : > { %v5670_v61 = vpop.f32.mrf.mxu0  ;;  %v5702_v62 = vpop.f32.mrf.mxu1 }
 0x253   : > { %v2735_v26 = vsel %vm2729_vm1, %v2716_v21, %v2717_v32  ;;  %v2720_v45 = vrot.slane %v5670_v61, 7 }
 0x254   : > { %v7171_v10 = vadd.f32 %v2859_v39, %v2735_v26  ;;  %v2669_v8 = vpop.f32.mrf.mxu0  ;;  %v2862_v41 = vpop.f32.mrf.mxu1 }
 0x255   : > { %v2718_v59 = vrot.slane %v2669_v8, 7 }
 0x256   : > { %v5673_v36 = vpop.f32.mrf.mxu0  ;;  %v5705_v63 = vpop.f32.mrf.mxu1 }
 0x257   : > { %v2734_v6 = vsel %vm2729_vm1, %v2718_v59, %v2719_v9  ;;  %v2723_v17 = vrot.slane %v5673_v36, 7 }
 0x258   : > { %v7175_v15 = vadd.f32 %v5701_v11, %v2734_v6  ;;  %v2682_v29 = vpop.f32.mrf.mxu0  ;;  %v2873_v12 = vpop.f32.mrf.mxu1 }
 0x259   : > { %v2721_v58 = vrot.slane %v2682_v29, 7 }
 0x25a   : > { %v5674_v60 = vpop.f32.mrf.mxu0  ;;  %v5706_v51 = vpop.f32.mrf.mxu1 }
 0x25b   : > { %v2733_v38 = vsel %vm2729_vm1, %v2720_v45, %v2721_v58  ;;  %v2724_v13 = vrot.slane %v5674_v60, 7 }
 0x25c   : > { %v7179_v55 = vadd.f32 %v2873_v12, %v2733_v38  ;;  %v2685_v25 = vpop.f32.mrf.mxu0  ;;  %v2876_v24 = vpop.f32.mrf.mxu1 }
 0x25d   : > { %v2722_v30 = vrot.slane %v2685_v25, 7 }
 0x25e   : > { %v5677_v33 = vpop.f32.mrf.mxu0  ;;  %v5709_v37 = vpop.f32.mrf.mxu1 }
 0x25f   : > { %v2732_v53 = vsel %vm2729_vm1, %v2722_v30, %v2723_v17  ;;  %v2727_v27 = vrot.slane %v5677_v33, 7 }
 0x260   : > { %v7183_v56 = vadd.f32 %v5705_v63, %v2732_v53  ;;  %v2698_v0 = vpop.f32.mrf.mxu0  ;;  %v2887_v48 = vpop.f32.mrf.mxu1 }
 0x261   : > { %v2725_v49 = vrot.slane %v2698_v0, 7 }
 0x262   : > { %v5678_v57 = vpop.f32.mrf.mxu0  ;;  %v5710_v50 = vpop.f32.mrf.mxu1 }
 0x263   : > { %v2731_v1 = vsel %vm2729_vm1, %v2724_v13, %v2725_v49  ;;  %v2728_v54 = vrot.slane %v5678_v57, 7 }
 0x264   : > { %v7187_v28 = vadd.f32 %v2887_v48, %v2731_v1  ;;  %v2701_v52 = vpop.f32.mrf.mxu0  ;;  %v2890_v7 = vpop.f32.mrf.mxu1 }
 0x265   : > { %v2737_v18 = vsel %vm2729_vm1, %v2728_v54, %v2713_v35  ;;  %v2726_v23 = vrot.slane %v2701_v52, 7 }
 0x266   : > { %v2900_v20 = vadd.f32 %v2845_v43, %v2737_v18 }
 0x267   : > { %v2730_v16 = vsel %vm2729_vm1, %v2726_v23, %v2727_v27  ;;  %v5729_v2 = vpop.f32.mrf.mxu0  ;;  %v5761_v11 = vpop.f32.mrf.mxu1 }
 0x268   : > { %v7193_v44 = vadd.f32 %v5709_v37, %v2730_v16  ;;  %v3072_v32 = vrot.slane %v5729_v2, 1  ;;  %v3330_v62 = vrot.slane %v5761_v11, 7 }
 0x269   : > { %v3007_v5 = vpop.f32.mrf.mxu0  ;;  %v7195_v3 = vpop.f32.mrf.mxu1 }
 0x26a   : > { %v3070_v41 = vrot.slane %v3007_v5, 1 }
 0x26b   : > { %v5730_v39 = vpop.f32.mrf.mxu0  ;;  %v5762_v21 = vpop.f32.mrf.mxu1 }
 0x26c   : > { %v3073_v61 = vrot.slane %v5730_v39, 1  ;;  %v3331_v38 = vrot.slane %v5762_v21, 7 }
 0x26d   : > { %v3010_v26 = vpop.f32.mrf.mxu0  ;;  %v3268_v8 = vpop.f32.mrf.mxu1 }
 0x26e   : > { %v3092_v43 = vsel %vm911_vm0, %v3072_v32, %v3073_v61  ;;  %v3071_v9 = vrot.slane %v3010_v26, 1  ;;  %v3329_v59 = vrot.slane %v3268_v8, 7 }
 0x26f   : > { %v5733_v36 = vpop.f32.mrf.mxu0  ;;  %v5765_v63 = vpop.f32.mrf.mxu1  ;;  %v3095_v6 = vadd.f32 %v3092_v43, %v7167_v31 }
 0x270   : > { %v3093_v29 = vsel %vm911_vm0, %v3070_v41, %v3071_v9  ;;  %v3350_v12 = vsel %vm2729_vm1, %v3329_v59, %v3330_v62  ;;  %v3076_v30 = vrot.slane %v5733_v36, 1  ;;  %v3334_v37 = vrot.slane %v5765_v63, 7 }
 0x271   : > { %v3023_v45 = vpop.f32.mrf.mxu0  ;;  %v3281_v58 = vpop.f32.mrf.mxu1  ;;  %v7204_v60 = vadd.f32 %v3350_v12, %v3095_v6  ;;  %v7206_v51 = vadd.f32 %v3093_v29, %v2900_v20 }
 0x272   : > { %v3332_v25 = vrot.slane %v3281_v58, 7  ;;  %v3074_v48 = vrot.slane %v3023_v45, 1 }
 0x273   : > { %v5734_v24 = vpop.f32.mrf.mxu0  ;;  %v5766_v17 = vpop.f32.mrf.mxu1 }
 0x274   : > { %v3077_v33 = vrot.slane %v5734_v24, 1  ;;  %v3349_v31 = vsel %vm2729_vm1, %v3331_v38, %v3332_v25  ;;  %v3335_v20 = vrot.slane %v5766_v17, 7  ;;  %v3328_v25 = vrot.slane %v7195_v3, 7 }
 0x275   : > { %v3026_v53 = vpop.f32.mrf.mxu0  ;;  %v3284_v0 = vpop.f32.mrf.mxu1 }
 0x276   : > { %v3090_v13 = vsel %vm911_vm0, %v3076_v30, %v3077_v33  ;;  %v3075_v49 = vrot.slane %v3026_v53, 1  ;;  %v3333_v57 = vrot.slane %v3284_v0, 7 }
 0x277   : > { %v5737_v50 = vpop.f32.mrf.mxu0  ;;  %v5769_v35 = vpop.f32.mrf.mxu1  ;;  %v3097_v1 = vadd.f32 %v3090_v13, %v7175_v15 }
 0x278   : > { %v3091_v54 = vsel %vm911_vm0, %v3074_v48, %v3075_v49  ;;  %v3348_v52 = vsel %vm2729_vm1, %v3333_v57, %v3334_v37  ;;  %v3080_v39 = vrot.slane %v5737_v50, 1  ;;  %v3338_v32 = vrot.slane %v5769_v35, 7 }
 0x279   : > { %v3039_v7 = vpop.f32.mrf.mxu0  ;;  %v3297_v27 = vpop.f32.mrf.mxu1  ;;  %v7217_v18 = vadd.f32 %v3348_v52, %v3097_v1  ;;  %v3096_v23 = vadd.f32 %v3091_v54, %v7171_v10 }
 0x27a   : > { %v3336_v16 = vrot.slane %v3297_v27, 7  ;;  %v3078_v26 = vrot.slane %v3039_v7, 1 }
 0x27b   : > { %v5738_v2 = vpop.f32.mrf.mxu0  ;;  %v5770_v11 = vpop.f32.mrf.mxu1  ;;  %v3354_v5 = vadd.f32 %v3349_v31, %v3096_v23 }
 0x27c   : > { %v3081_v21 = vrot.slane %v5738_v2, 1  ;;  %v3347_v15 = vsel %vm2729_vm1, %v3335_v20, %v3336_v16  ;;  %v3339_v58 = vrot.slane %v5770_v11, 7 }
 0x27d   : > { %v3042_v61 = vpop.f32.mrf.mxu0  ;;  %v3300_v62 = vpop.f32.mrf.mxu1 }
 0x27e   : > { %v3088_v8 = vsel %vm911_vm0, %v3080_v39, %v3081_v21  ;;  %v3079_v41 = vrot.slane %v3042_v61, 1  ;;  %v3337_v43 = vrot.slane %v3300_v62, 7 }
 0x27f   : > { %v5741_v10 = vpop.f32.mrf.mxu0  ;;  %v5773_v9 = vpop.f32.mrf.mxu1  ;;  %v3099_v59 = vadd.f32 %v3088_v8, %v7183_v56 }
 0x280   : > { %v3089_v36 = vsel %vm911_vm0, %v3078_v26, %v3079_v41  ;;  %v3346_v63 = vsel %vm2729_vm1, %v3337_v43, %v3338_v32  ;;  %v3084_v56 = vrot.slane %v5741_v10, 1  ;;  %v3342_v53 = vrot.slane %v5773_v9, 7 }
 0x281   : > { %v3055_v6 = vpop.f32.mrf.mxu0  ;;  %v3313_v29 = vpop.f32.mrf.mxu1  ;;  %v7229_v12 = vadd.f32 %v3346_v63, %v3099_v59  ;;  %v3098_v45 = vadd.f32 %v3089_v36, %v7179_v55 }
 0x282   : > { %v3340_v38 = vrot.slane %v3313_v29, 7  ;;  %v3082_v0 = vrot.slane %v3055_v6, 1 }
 0x283   : > { %v5742_v24 = vpop.f32.mrf.mxu0  ;;  %v5774_v17 = vpop.f32.mrf.mxu1  ;;  %v7233_v30 = vadd.f32 %v3347_v15, %v3098_v45 }
 0x284   : > { %v3085_v33 = vrot.slane %v5742_v24, 1  ;;  %v3343_v31 = vrot.slane %v5774_v17, 7  ;;  %v3345_v37 = vsel %vm2729_vm1, %v3339_v58, %v3340_v38 }
 0x285   : > { %v3058_v48 = vpop.f32.mrf.mxu0  ;;  %v3316_v13 = vpop.f32.mrf.mxu1 }
 0x286   : > { %v3086_v55 = vsel %vm911_vm0, %v3084_v56, %v3085_v33  ;;  %v3083_v49 = vrot.slane %v3058_v48, 1  ;;  %v3341_v57 = vrot.slane %v3316_v13, 7  ;;  %v3351_v3 = vsel %vm2729_vm1, %v3343_v31, %v3328_v25 }
 0x287   : > { %v3352_v50 = vadd.f32 %v3351_v3, %v7206_v51  ;;  %v3101_v35 = vadd.f32 %v3086_v55, %v7193_v44 }
 0x288   : > { %v3087_v1 = vsel %vm911_vm0, %v3082_v0, %v3083_v49  ;;  %v5793_v54 = vpop.f32.mrf.mxu0  ;;  %v7245_v52 = vpop.f32.mrf.mxu1  ;;  %v3344_v7 = vsel %vm2729_vm1, %v3341_v57, %v3342_v53 }
 0x289   : > { %v7250_v27 = vadd.f32 %v5793_v54, %v7204_v60  ;;  %v7252_v23 = vadd.f32 %v3344_v7, %v3101_v35  ;;  %v3100_v20 = vadd.f32 %v3087_v1, %v7187_v28 }
 0x28a   : > { %v3459_v16 = vpop.f32.mrf.mxu0  ;;  %v7255_v51 = vpop.f32.mrf.mxu1 }
 0x28b   : > { %v7257_v44 = vadd.f32 %v3459_v16, %v3352_v50  ;;  %v7259_v2 = vadd.f32 %v3345_v37, %v3100_v20 }
 0x28c   : > { %v5794_v11 = vpop.f32.mrf.mxu0  ;;  %v5826_v39 = vpop.f32.mrf.mxu1 }
 0x28e   : > { %v3462_v21 = vpop.f32.mrf.mxu0  ;;  %v3624_v15 = vpop.f32.mrf.mxu1 }
 0x28f   : > { %v3687_v21 = vrot.slane %v5826_v39, 1 }
 0x290   : > { %v5797_v32 = vpop.f32.mrf.mxu0  ;;  %v7261_v61 = vpop.f32.mrf.mxu1 }
 0x291   : > { %v7264_v60 = vadd.f32 %v5797_v32, %v7217_v18  ;;  %v3685_v32 = vrot.slane %v3624_v15, 1 }
 0x292   : > { %v3473_v62 = vpop.f32.mrf.mxu0  ;;  %v7266_v26 = vpop.f32.mrf.mxu1 }
 0x293   : > { %v7268_v28 = vadd.f32 %v3473_v62, %v3354_v5  ;;  %v3688_v15 = vrot.slane %v7266_v26, 1  ;;  %v3690_v26 = vrot.slane %v7261_v61, 1 }
 0x294   : > { %v5798_v8 = vpop.f32.mrf.mxu0  ;;  %v7270_v41 = vpop.f32.mrf.mxu1 }
 0x296   : > { %v3476_v43 = vpop.f32.mrf.mxu0  ;;  %v3640_v10 = vpop.f32.mrf.mxu1 }
 0x297   : > { %v7325_v43 = vld [vmem:[%s7486_s6] ss:$0 sm:$0xff] }
 0x298   : > { %v7272_v9 = vpop.f32.mrf.mxu0  ;;  %v5833_v59 = vpop.f32.mrf.mxu1 }
 0x29a   : > { %v7274_v36 = vpop.f32.mrf.mxu0  ;;  %v7276_v63 = vpop.f32.mrf.mxu1 }
 0x29c   : > { %v5802_v6 = vpop.f32.mrf.mxu0  ;;  %v5834_v18 = vpop.f32.mrf.mxu1 }
 0x29d   : > { %v3686_v6 = vrot.slane %v7245_v52, 1 }
 0x29e   : > { %v3490_v29 = vpop.f32.mrf.mxu0  ;;  %v7278_v45 = vpop.f32.mrf.mxu1 }
 0x29f   : > { %v3689_v29 = vrot.slane %v3640_v10, 1  ;;  %v3706_v39 = vsel %vm911_vm0, %v3686_v6, %v3687_v21  ;;  %v3694_v10 = vrot.slane %v5833_v59, 1  ;;  %v7347_v21 = vadd.f32 %v7033_v42, %v7325_v43 }
 0x2a0   : > { %v7280_v58 = vpop.f32.mrf.mxu0  ;;  %v7282_v5 = vpop.f32.mrf.mxu1  ;;  %v3709_v59 = vadd.f32 %v3706_v39, %v7250_v27  ;;  %v3692_v27 = vrot.slane %v7276_v63, 1 }
 0x2a1   : > { %v3521_v63 = vadd.f32 %v7280_v58, %v7252_v23 }
 0x2a2   : > { %v7284_v38 = vpop.f32.mrf.mxu0  ;;  %v7286_v25 = vpop.f32.mrf.mxu1 }
 0x2a4   : > { %v5806_v24 = vpop.f32.mrf.mxu0  ;;  %v7288_v17 = vpop.f32.mrf.mxu1 }
 0x2a5   : > { %v3684_v24 = vrot.slane %v7255_v51, 1  ;;  %v3699_v39 = vrot.slane %v7288_v17, 1 }
 0x2a6   : > { %v3504_v56 = vpop.f32.mrf.mxu0  ;;  %v7290_v33 = vpop.f32.mrf.mxu1 }
 0x2a7   : > { %v3695_v56 = vrot.slane %v5834_v18, 1  ;;  %v3707_v52 = vsel %vm911_vm0, %v3684_v24, %v3685_v32 }
 0x2a8   : > { %v3708_v42 = vadd.f32 %v3707_v52, %v7257_v44  ;;  %v3518_v44 = vadd.f32 %v7274_v36, %v7233_v30 }
 0x2a9   : > { %v7292_v31 = vpop.f32.mrf.mxu0  ;;  %v7294_v37 = vpop.f32.mrf.mxu1  ;;  %v3702_v32 = vsel %vm911_vm0, %v3694_v10, %v3695_v56 }
 0x2ab   : > { %v7296_v53 = vpop.f32.mrf.mxu0  ;;  %v7298_v0 = vpop.f32.mrf.mxu1 }
 0x2ad   : > { %v7300_v48 = vpop.f32.mrf.mxu0  ;;  %v5890_v13 = vpop.f32.mrf.mxu1 }
 0x2af   : > { %v7302_v55 = vpop.f32.mrf.mxu0  ;;  %v4077_v49 = vpop.f32.mrf.mxu1 }
 0x2b1   : > { %v7304_v57 = vpop.f32.mrf.mxu0  ;;  %v7306_v3 = vpop.f32.mrf.mxu1 }
 0x2b3   : > { %v7308_v50 = vpop.f32.mrf.mxu0  ;;  %v7310_v35 = vpop.f32.mrf.mxu1 }
 0x2b4   : > { %v3947_v36 = vrot.slane %v7308_v50, 7  ;;  %v3946_v50 = vrot.slane %v7300_v48, 7 }
 0x2b5   : > { %v7312_v1 = vpop.f32.mrf.mxu0  ;;  %v5894_v54 = vpop.f32.mrf.mxu1 }
 0x2b6   : > { %v3691_v54 = vrot.slane %v7270_v41, 1  ;;  %v7354_v41 = vadd.f32 %v7325_v43, %v7035_v47  ;;  %v3944_v47 = vrot.slane %v7302_v55, 7 }
 0x2b7   : > { %v7314_v7 = vpop.f32.mrf.mxu0  ;;  %v4091_v20 = vpop.f32.mrf.mxu1 }
 0x2b8   : > { %v7337_v20 = vadd.f32 %v6985_v46, %v7325_v43  ;;  %v3705_v46 = vsel %vm911_vm0, %v3688_v15, %v3689_v29  ;;  %v3704_v61 = vsel %vm911_vm0, %v3690_v26, %v3691_v54  ;;  %v3519_v29 = vadd.f32 %v7272_v9, %v7229_v12 }
 0x2b9   : > { %v5865_v16 = vpop.f32.mrf.mxu0  ;;  %v7316_v11 = vpop.f32.mrf.mxu1  ;;  %v3710_v56 = vadd.f32 %v3705_v46, %v7268_v28  ;;  %v3697_v54 = vrot.slane %v7290_v33, 1  ;;  %v3945_v12 = vrot.slane %v7292_v31, 7  ;;  %v3698_v28 = vrot.slane %v7282_v5, 1 }
 0x2ba   : > { %v3713_v52 = vadd.f32 %v3702_v32, %v3519_v29  ;;  %v3953_v17 = vrot.slane %v5865_v16, 7  ;;  %v3948_v33 = vrot.slane %v7314_v7, 7  ;;  %v3943_v46 = vrot.slane %v7296_v53, 7 }
 0x2bb   : > { %v7318_v62 = vpop.f32.mrf.mxu0  ;;  %v7320_v8 = vpop.f32.mrf.mxu1  ;;  %v3965_v30 = vsel %vm2729_vm1, %v3944_v47, %v3945_v12  ;;  %v3700_v31 = vsel %vm911_vm0, %v3698_v28, %v3699_v39  ;;  %v3949_v7 = vrot.slane %v7304_v57, 7  ;;  %v3520_v47 = vadd.f32 %v7284_v38, %v7259_v2 }
 0x2bc   : > { %v3951_v26 = vrot.slane %v7318_v62, 7  ;;  %v3968_v32 = vadd.f32 %v3965_v30, %v3709_v59  ;;  %v3711_v2 = vadd.f32 %v3704_v61, %v7264_v60  ;;  %v3715_v38 = vadd.f32 %v3700_v31, %v3521_v63 }
 0x2bd   : > { %v7329_v13 = vpop.f32.mrf.mxu0  ;;  %v5898_v49 = vpop.f32.mrf.mxu1  ;;  %v3963_v39 = vsel %vm2729_vm1, %v3948_v33, %v3949_v7 }
 0x2be   : > { %v7343_v49 = vadd.f32 %v7325_v43, %v6987_v22  ;;  %v3693_v22 = vrot.slane %v7278_v45, 1  ;;  %v3954_v57 = vrot.slane %v7329_v13, 7  ;;  %v4130_v13 = vadd.f32 %v7294_v37, %v3968_v32 }
 0x2bf   : > { %v3915_v51 = vpop.f32.mrf.mxu0  ;;  %v4105_v18 = vpop.f32.mrf.mxu1 }
 0x2c0   : > { %v3952_v45 = vrot.slane %v3915_v51, 7  ;;  %v3703_v9 = vsel %vm911_vm0, %v3692_v27, %v3693_v22  ;;  %v3696_v18 = vrot.slane %v7286_v25, 1  ;;  %v3950_v22 = vrot.slane %v7312_v1, 7 }
 0x2c1   : > { %v5869_v6 = vpop.f32.mrf.mxu0  ;;  %v7360_v24 = vpop.f32.mrf.mxu1  ;;  %v3964_v27 = vsel %vm2729_vm1, %v3946_v50, %v3947_v36 }
 0x2c2   : > { %v3961_v23 = vsel %vm2729_vm1, %v3952_v45, %v3953_v17  ;;  %v3701_v25 = vsel %vm911_vm0, %v3696_v18, %v3697_v54  ;;  %v3962_v48 = vsel %vm2729_vm1, %v3950_v22, %v3951_v26  ;;  %v3957_v1 = vrot.slane %v5869_v6, 7 }
 0x2c3   : > { %v3928_v15 = vpop.f32.mrf.mxu0  ;;  %v7371_v10 = vpop.f32.mrf.mxu1  ;;  %v3972_v45 = vadd.f32 %v3961_v23, %v3713_v52  ;;  %v3714_v12 = vadd.f32 %v3701_v25, %v3520_v47  ;;  %v3970_v6 = vadd.f32 %v3963_v39, %v3711_v2 }
 0x2c4   : > { %v3955_v29 = vrot.slane %v3928_v15, 7  ;;  %v3712_v15 = vadd.f32 %v3703_v9, %v3518_v44 }
 0x2c5   : > { %v5870_v55 = vpop.f32.mrf.mxu0  ;;  %v5902_v51 = vpop.f32.mrf.mxu1  ;;  %v4134_v60 = vadd.f32 %v7316_v11, %v3972_v45  ;;  %v4132_v39 = vadd.f32 %v7306_v3, %v3970_v6 }
 0x2c6   : > { %v3958_v58 = vrot.slane %v5870_v55, 7  ;;  %v3969_v55 = vadd.f32 %v3964_v27, %v3710_v56  ;;  %v3960_v52 = vsel %vm2729_vm1, %v3954_v57, %v3955_v29  ;;  %v3971_v18 = vadd.f32 %v3962_v48, %v3712_v15 }
 0x2c7   : > { %v3931_v5 = vpop.f32.mrf.mxu0  ;;  %v4119_v16 = vpop.f32.mrf.mxu1  ;;  %v3973_v56 = vadd.f32 %v3960_v52, %v3714_v12 }
 0x2c8   : > { %v3956_v62 = vrot.slane %v3931_v5, 7  ;;  %v3966_v59 = vsel %vm2729_vm1, %v3958_v58, %v3943_v46  ;;  %v4133_v46 = vadd.f32 %v7320_v8, %v3971_v18 }
 0x2c9   : > { %v3967_v30 = vadd.f32 %v3966_v59, %v3708_v42  ;;  %v7421_v42 = vld [vmem:[%s7484_s4] ss:$0 sm:$0xff]  ;;  %v4135_v57 = vadd.f32 %v7371_v10, %v3973_v56 }
 0x2ca   : > { %v5921_v53 = vpop.f32.mrf.mxu0  ;;  %v5929_v54 = vpop.f32.mrf.mxu1  ;;  %v3959_v51 = vsel %vm2729_vm1, %v3956_v62, %v3957_v1  ;;  %v4131_v62 = vadd.f32 %v7310_v35, %v3969_v55 }
 0x2cb   : > { %v4301_v44 = vrot.slane %v5921_v53, 1  ;;  %v4309_v9 = vrot.slane %v5929_v54, 1  ;;  %v3974_v31 = vadd.f32 %v3959_v51, %v3715_v38  ;;  %v4129_v32 = vadd.f32 %v7298_v0, %v3967_v30 }
 0x2cc   : > { %v4236_v28 = vpop.f32.mrf.mxu0  ;;  %v4268_v17 = vpop.f32.mrf.mxu1 }
 0x2cd   : > { %v4299_v26 = vrot.slane %v4236_v28, 1  ;;  %v4307_v23 = vrot.slane %v4268_v17, 1  ;;  %v4136_v59 = vadd.f32 %v7360_v24, %v3974_v31 }
 0x2ce   : > { %v5922_v36 = vpop.f32.mrf.mxu0  ;;  %v5930_v61 = vpop.f32.mrf.mxu1 }
 0x2cf   : > { %v4302_v63 = vrot.slane %v5922_v36, 1  ;;  %v4310_v33 = vrot.slane %v5930_v61, 1 }
 0x2d0   : > { %v4239_v58 = vpop.f32.mrf.mxu0  ;;  %v4271_v5 = vpop.f32.mrf.mxu1 }
 0x2d1   : > { %v4321_v37 = vsel %vm911_vm0, %v4301_v44, %v4302_v63  ;;  %v4317_v11 = vsel %vm911_vm0, %v4309_v9, %v4310_v33  ;;  %v4300_v16 = vrot.slane %v4239_v58, 1  ;;  %v4308_v25 = vrot.slane %v4271_v5, 1 }
 0x2d2   : > { %v4324_v50 = vadd.f32 %v4321_v37, %v4130_v13  ;;  %v4328_v7 = vadd.f32 %v4317_v11, %v4134_v60  ;;  %v5925_v22 = vpop.f32.mrf.mxu0  ;;  %v5933_v29 = vpop.f32.mrf.mxu1  ;;  %v2483_v63 = vadd.f32 %v7057_v34, %v7325_v43  ;;  %v2448_v34 = vadd.f32 %v7325_v43, %v7011_v40 }
 0x2d3   : > { %v4322_v47 = vsel %vm911_vm0, %v4299_v26, %v4300_v16  ;;  %v4318_v27 = vsel %vm911_vm0, %v4307_v23, %v4308_v25  ;;  %v4305_v35 = vrot.slane %v5925_v22, 1  ;;  %v4313_v1 = vrot.slane %v5933_v29, 1 }
 0x2d4   : > { %v4339_v45 = vadd.f32 %v7421_v42, %v4324_v50  ;;  %v4343_v8 = vadd.f32 %v7421_v42, %v4328_v7  ;;  %v4323_v53 = vadd.f32 %v4322_v47, %v4129_v32  ;;  %v4327_v54 = vadd.f32 %v4318_v27, %v4133_v46  ;;  %v4252_v0 = vpop.f32.mrf.mxu0  ;;  %v4284_v48 = vpop.f32.mrf.mxu1 }
 0x2d5   : > { %v4303_v10 = vrot.slane %v4252_v0, 1  ;;  %v4311_v17 = vrot.slane %v4284_v48, 1  ;;  %v2476_v58 = vadd.f32 %v7325_v43, %v7059_v14 }
 0x2d6   : > { %v4347_v2 = vadd.f32 %v4339_v45, %v7337_v20  ;;  %v4351_v38 = vadd.f32 %v4343_v8, %v7347_v21  ;;  %v4338_v3 = vadd.f32 %v7421_v42, %v4323_v53  ;;  %v4342_v15 = vadd.f32 %v7421_v42, %v4327_v54  ;;  %v5926_v12 = vpop.f32.mrf.mxu0  ;;  %v5934_v28 = vpop.f32.mrf.mxu1 }
 0x2d7   : > { %v4306_v24 = vrot.slane %v5926_v12, 1  ;;  %v4314_v55 = vrot.slane %v5934_v28, 1 }
 0x2d8   : > { %v4355_v20 = vmax.f32 %v4347_v2, 0.0  ;;  %v4359_v52 = vmax.f32 %v4351_v38, 0.0  ;;  %v4346_v21 = vadd.f32 %v4338_v3, %v7343_v49  ;;  %v4350_v51 = vadd.f32 %v4342_v15, %v7354_v41  ;;  %v4255_v13 = vpop.f32.mrf.mxu0  ;;  %v4287_v6 = vpop.f32.mrf.mxu1 }
 0x2d9   : > { %v4319_v18 = vsel %vm911_vm0, %v4305_v35, %v4306_v24  ;;  %v4315_v30 = vsel %vm911_vm0, %v4313_v1, %v4314_v55  ;;  %v4304_v36 = vrot.slane %v4255_v13, 1  ;;  %v4312_v60 = vrot.slane %v4287_v6, 1 }
 0x2da   : > { %4363 = vst [vmem:[%s7445_s11 + $0x8] sm:$0xff] %v4355_v20  ;;  %4367 = vst [vmem:[%s7445_s11 + $0x28] sm:$0xff] %v4359_v52  ;;  %v4354_v61 = vmax.f32 %v4346_v21, 0.0  ;;  %v4358_v44 = vmax.f32 %v4350_v51, 0.0  ;;  %v4326_v9 = vadd.f32 %v4319_v18, %v4132_v39  ;;  %v4330_v49 = vadd.f32 %v4315_v30, %v4136_v59 }
 0x2db   : > { %v2455_v41 = vadd.f32 %v7009_v19, %v7325_v43  ;;  %v4320_v33 = vsel %vm911_vm0, %v4303_v10, %v4304_v36  ;;  %v4316_v56 = vsel %vm911_vm0, %v4311_v17, %v4312_v60 }
 0x2dc   : > { %4362 = vst [vmem:[%s7445_s11] sm:$0xff] %v4354_v61  ;;  %4366 = vst [vmem:[%s7445_s11 + $0x20] sm:$0xff] %v4358_v44  ;;  %v4341_v31 = vadd.f32 %v7421_v42, %v4326_v9  ;;  %v4345_v26 = vadd.f32 %v7421_v42, %v4330_v49  ;;  %v4325_v23 = vadd.f32 %v4320_v33, %v4131_v62 }
 0x2dd   : > { %v4329_v19 = vadd.f32 %v4316_v56, %v4135_v57 }
 0x2de   : > { %v4349_v4 = vadd.f32 %v4341_v31, %v2455_v41  ;;  %v4353_v5 = vadd.f32 %v4345_v26, %v2483_v63  ;;  %v4340_v37 = vadd.f32 %v7421_v42, %v4325_v23 }
 0x2df   : > { %v4344_v11 = vadd.f32 %v7421_v42, %v4329_v19 }
 0x2e0   : > { %v4357_v16 = vmax.f32 %v4349_v4, 0.0  ;;  %v4361_v25 = vmax.f32 %v4353_v5, 0.0  ;;  %v4348_v46 = vadd.f32 %v4340_v37, %v2448_v34 }
 0x2e1   : > { %v4352_v50 = vadd.f32 %v4344_v11, %v2476_v58 }
 0x2e2   : > { %4365 = vst [vmem:[%s7445_s11 + $0x18] sm:$0xff] %v4357_v16  ;;  %4369 = vst [vmem:[%s7445_s11 + $0x38] sm:$0xff] %v4361_v25  ;;  %v4356_v7 = vmax.f32 %v4348_v46, 0.0 }
 0x2e3   : > { %v4360_v32 = vmax.f32 %v4352_v50, 0.0 }
 0x2e4   : > { %4364 = vst [vmem:[%s7445_s11 + $0x10] sm:$0xff] %v4356_v7 }
 0x2e5   : > { %4368 = vst [vmem:[%s7445_s11 + $0x30] sm:$0xff] %v4360_v32 }
 0x2e6 PF: > { %s17_s24 = sadd.s32 1, %s6199_s24  }
 0x2e7   : > { %p14_p4 = scmp.ge.s32.totalorder %s17_s24, 4  }
 0x2e9   :  { %16 = sbr.rel (!%p14_p4) target bundleno = 1 (0x1), region = 102 }

</bundles_post_ra>
